<compile_context>
chip_gen: v7x
topology: tpu7x:2x2x1
jax: 0.10.0
libtpu: 0.0.40
codegen_flags: <defaults>
</compile_context>

<pallas_src>
import jax
import jax.numpy as jnp
from jax import lax
from jax.experimental import pallas as pl
from jax.experimental.pallas import tpu as pltpu


# ------------------------------- kernel ----------------------------------


def _make_triplane_kernel(res: int, feat: int, n_block_planes: int):
    """Kernel over one batch tile.

    coords_ref: (P, 2, TB) f32 in [0,1]      (P = n_block_planes)
    planes_ref: (P, C*R, R) f32              (row index = c*R + h, col = w)
    out_ref   : (P*C, TB)  f32
    """

    def kernel(coords_ref, planes_ref, out_ref):
        tb = out_ref.shape[-1]
        # Row-index grid reused for both separable weight factors.
        ridx = lax.broadcasted_iota(jnp.int32, (res, tb), 0).astype(jnp.float32)

        for p in range(n_block_planes):  # 3 (fused) or 1 (plane-tiled grid)
            cp = coords_ref[p]                                   # (2, TB)
            u = jnp.clip(cp[0:1, :], 0.0, 1.0) * (res - 1)       # width  coord (1, TB)
            v = jnp.clip(cp[1:2, :], 0.0, 1.0) * (res - 1)       # height coord (1, TB)

            # Tent-function bilinear weights (identical to the floor/frac form,
            # including the clamped edge) — pure VPU, no int casts.
            ww = jnp.maximum(0.0, 1.0 - jnp.abs(ridx - u))       # (R, TB)
            wh = jnp.maximum(0.0, 1.0 - jnp.abs(ridx - v))       # (R, TB)

            # Stage 1: contract over W on the MXU.
            t = jnp.dot(planes_ref[p], ww,
                        preferred_element_type=jnp.float32)      # (C*R, TB)

            # Stage 2: weight rows by Wh and reduce over H on the sublane/XLU
            # path (replaces the old selector matmul + jnp.tile).
            out_p = (t.reshape(feat, res, tb) * wh[None, :, :]).sum(axis=1)  # (C, TB)

            out_ref[p * feat:(p + 1) * feat, :] = out_p.astype(out_ref.dtype)

    return kernel


# ------------------------------- wrapper ----------------------------------


def _round_up(a: int, m: int) -> int:
    return ((a + m - 1) // m) * m


def _vmem_capacity_bytes() -> int:
    try:
        info = pltpu.get_tpu_info()
        cap = int(getattr(info, "vmem_capacity_bytes", 0) or 0)
        if cap > 0:
            return cap
    except Exception:
        pass
    return 128 << 20  # v5e / v6e default


def init_triplane_params(key, feature_size, res, level):
    offsets = [0]
    for i in range(level):
        offsets.append(offsets[-1] + (res // 2 ** i) ** 2)
    offsets = jnp.array(offsets, dtype=jnp.int32)
    mat = 0.1 * jax.random.normal(key, (3, feature_size, res, res), dtype=jnp.float32)
    return {"mat": mat, "offsets": offsets, "feature_size": feature_size,
            "res": res, "level": level}


def triplane_encoding_forward(x, mat, r=None, *, batch_tile=1024,
                              force_plane_split=None):
    """x: (B, 3) positions in [0,1]; mat: (3, C, R, R). Returns (B, 3*C)."""
    if r is not None:
        # TODO(synk): mip-mapped path (create_mip / fetch_mip_2d) needs a per-point
        # data-dependent level gather into the flattened mip pool; not implemented.
        raise NotImplementedError("mip-mapped query (r != None) not implemented")

    B = x.shape[0]
    n_planes, C, R, R2 = mat.shape
    assert n_planes == 3 and R == R2

    if B == 0:
        return jnp.zeros((0, 3 * C), dtype=x.dtype)

    # ------------- generation-aware VMEM budgeting & path choice -------------
    cap = _vmem_capacity_bytes()
    budget = max(cap - (16 << 20), 16 << 20)          # leave compiler/DMA headroom

    plane_bytes = 4 * C * R * R                       # one plane, f32
    single_buffer_planes = 3 * plane_bytes > (4 << 20)  # only matters at large R
    fused_resident = 3 * plane_bytes * (1 if single_buffer_planes else 2)
    split_resident = 2 * plane_bytes                  # double-buffered (1, C*R, R)

    # Bytes of VMEM per unit of batch-tile width (coords/out blocks 2x-buffered,
    # live temps t / product / ww / wh / out_p with a 3x safety factor).
    fused_per_tb = 4 * (2 * 3 * 2 + 2 * 3 * C + 3 * (C * R + 2 * R + 2 * C))
    split_per_tb = 4 * (2 * 2 + 2 * C + 3 * (C * R + 2 * R + 2 * C))

    if force_plane_split is None:
        use_split = fused_resident + 128 * fused_per_tb > budget
    else:
        use_split = bool(force_plane_split)

    resident = split_resident if use_split else fused_resident
    per_tb = split_per_tb if use_split else fused_per_tb

    # Batch tile: multiple of 128 lanes, >= 2 tiles when B allows (megacore),
    # capped by batch_tile and by what fits in the VMEM budget.
    tb_target = max(128, min(batch_tile, _round_up(-(-B // 2), 128)))
    avail = budget - resident
    tb_fit = max(128, (avail // per_tb) // 128 * 128) if avail > 0 else 128
    tb = min(tb_target, tb_fit)

    n_tiles = (B + tb - 1) // tb
    B_pad = n_tiles * tb

    # plane 0 samples (x0, x1); plane 1 samples (x1, x2); plane 2 samples (x2, x0)
    coords = jnp.stack(
        [x[:, (0, 1)].T, x[:, (1, 2)].T, x[:, (2, 0)].T], axis=0
    ).astype(jnp.float32)                                        # (3, 2, B)
    if B_pad != B:
        coords = jnp.pad(coords, ((0, 0), (0, 0), (0, B_pad - B)))

    planes = mat.astype(jnp.float32).reshape(3, C * R, R)        # (3, C*R, R)

    flops = int(3 * 2 * C * R * (R + 1) * B_pad)
    bytes_accessed = int(4 * (3 * 2 * B_pad + 3 * C * R * R + 3 * C * B_pad))

    vmem_est = resident + tb * per_tb
    compiler_kwargs = {}
    if vmem_est > (16 << 20):
        compiler_kwargs["vmem_limit_bytes"] = int(min(vmem_est + (8 << 20),
                                                      cap - (8 << 20)))

    if use_split:
        # (plane, batch) grid: one plane resident per step; keeps resident VMEM
        # bounded at large R (mandatory on v7x's 64 MiB VMEM).
        grid = (3, n_tiles)
        in_specs = [
            pl.BlockSpec((1, 2, tb), lambda p, b: (p, 0, b)),
            pl.BlockSpec((1, C * R, R), lambda p, b: (p, 0, 0)),
        ]
        out_specs = pl.BlockSpec((C, tb), lambda p, b: (p, b))
        kernel = _make_triplane_kernel(R, C, 1)
        compiler_kwargs["dimension_semantics"] = ("arbitrary", "parallel")
    else:
        # Fused 3-plane kernel: planes stay resident (constant index_map);
        # single-buffer them once they are big enough for it to matter.
        grid = (n_tiles,)
        plane_spec_kwargs = {}
        if single_buffer_planes:
            plane_spec_kwargs["pipeline_mode"] = pl.Buffered(1)
        in_specs = [
            pl.BlockSpec((3, 2, tb), lambda b: (0, 0, b)),
            pl.BlockSpec((3, C * R, R), lambda b: (0, 0, 0), **plane_spec_kwargs),
        ]
        out_specs = pl.BlockSpec((3 * C, tb), lambda b: (0, b))
        kernel = _make_triplane_kernel(R, C, 3)
        compiler_kwargs["dimension_semantics"] = ("parallel",)

    out = pl.pallas_call(
        kernel,
        out_shape=jax.ShapeDtypeStruct((3 * C, B_pad), jnp.float32),
        grid=grid,
        in_specs=in_specs,
        out_specs=out_specs,
        compiler_params=pltpu.CompilerParams(**compiler_kwargs),
        cost_estimate=pl.CostEstimate(flops=flops, transcendentals=0,
                                      bytes_accessed=bytes_accessed),
    )(coords, planes)

    # (3*C, B_pad) -> (B, 3*C) == torch.cat([f0, f1, f2], dim=-1)
    return out[:, :B].T.astype(x.dtype)


# ---------------- pure-JAX reference for correctness check ----------------


def _ref_fetch_2d(coords, plane, res):
    # coords: (B, 2), plane: (C, R, R) -> (C, B)   (same convention as kernel)
    u = jnp.clip(coords[:, 0], 0.0, 1.0) * (res - 1)
    v = jnp.clip(coords[:, 1], 0.0, 1.0) * (res - 1)
    i0w = jnp.floor(u).astype(jnp.int32)
    i0h = jnp.floor(v).astype(jnp.int32)
    i1w = jnp.minimum(i0w + 1, res - 1)
    i1h = jnp.minimum(i0h + 1, res - 1)
    fw = u - i0w
    fh = v - i0h
    g = lambda ih, iw: plane[:, ih, iw]  # (C, B)
    return (g(i0h, i0w) * (1 - fh) * (1 - fw) + g(i0h, i1w) * (1 - fh) * fw
            + g(i1h, i0w) * fh * (1 - fw) + g(i1h, i1w) * fh * fw)


def _ref_forward(x, mat):
    res = mat.shape[-1]
    f0 = _ref_fetch_2d(x[:, (0, 1)], mat[0], res).T
    f1 = _ref_fetch_2d(x[:, (1, 2)], mat[1], res).T
    f2 = _ref_fetch_2d(x[:, (2, 0)], mat[2], res).T
    return jnp.concatenate([f0, f1, f2], axis=-1)


if __name__ == "__main__":
    feature_size, res, level = 16, 16, 3
    B = 200  # intentionally ragged (not a multiple of the batch tile)

    key = jax.random.PRNGKey(0)
    k_mat, k_x = jax.random.split(key)
    params = init_triplane_params(k_mat, feature_size, res, level)
    x = jax.random.uniform(k_x, (B, 3), dtype=jnp.float32)

    ref = _ref_forward(x, params["mat"])

    # Auto path (fused 3-plane kernel at this small R).
    f = triplane_encoding_forward(x, params["mat"])
    f = jax.block_until_ready(f)
    assert f.shape == (B, 3 * feature_size), f.shape
    assert jnp.allclose(f, ref, atol=1e-5, rtol=1e-5), float(jnp.abs(f - ref).max())

    # Also validate the (plane, batch) grid layout used for large R / v7x.
    f2 = triplane_encoding_forward(x, params["mat"], force_plane_split=True)
    f2 = jax.block_until_ready(f2)
    assert f2.shape == (B, 3 * feature_size), f2.shape
    assert jnp.allclose(f2, ref, atol=1e-5, rtol=1e-5), float(jnp.abs(f2 - ref).max())

    print("KERNEL_OK")
</pallas_src>

<mosaic_0001>
module attributes {stable_mosaic.version = 11 : i64} {
  func.func @kernel(%arg0: i32, %arg1: memref<3x2x128xf32, #tpu.memory_space<vmem>>, %arg2: memref<3x256x16xf32, #tpu.memory_space<vmem>>, %arg3: memref<48x128xf32, #tpu.memory_space<vmem>>) attributes {dimension_semantics = [#tpu.dimension_semantics<parallel>], iteration_bounds = array<i64: 2>, scalar_prefetch = 0 : i64, scratch_operands = 0 : i64, tpu.core_type = #tpu.core_type<tc>, window_params = [{transform_indices = @transform_0, window_bounds = array<i64: 3, 2, 128>}, {pipeline_mode = #tpu.pipeline_mode<synchronous>, transform_indices = @transform_1, window_bounds = array<i64: 3, 256, 16>}, {transform_indices = @transform_2, window_bounds = array<i64: 48, 128>}]} {
    %0 = tpu.iota {dimensions = array<i32: 0>} : vector<16x128xi32>
    %1 = arith.sitofp %0 : vector<16x128xi32> to vector<16x128xf32>
    %c0 = arith.constant 0 : index
    %c0_0 = arith.constant 0 : index
    %c0_1 = arith.constant 0 : index
    %2 = vector.load %arg1[%c0, %c0_0, %c0_1] : memref<3x2x128xf32, #tpu.memory_space<vmem>>, vector<1x2x128xf32>
    %3 = vector.shape_cast %2 : vector<1x2x128xf32> to vector<2x128xf32>
    %4 = vector.extract_strided_slice %3 {offsets = [0, 0], sizes = [1, 128], strides = [1, 1]} : vector<2x128xf32> to vector<1x128xf32>
    %cst = arith.constant 0.000000e+00 : f32
    %cst_2 = arith.constant 1.000000e+00 : f32
    %5 = vector.broadcast %cst : f32 to vector<1x128xf32>
    %6 = arith.maximumf %5, %4 : vector<1x128xf32>
    %7 = vector.broadcast %cst_2 : f32 to vector<1x128xf32>
    %8 = arith.minimumf %7, %6 : vector<1x128xf32>
    %cst_3 = arith.constant 1.500000e+01 : f32
    %9 = vector.broadcast %cst_3 : f32 to vector<1x128xf32>
    %10 = arith.mulf %8, %9 : vector<1x128xf32>
    %11 = vector.extract_strided_slice %3 {offsets = [1, 0], sizes = [1, 128], strides = [1, 1]} : vector<2x128xf32> to vector<1x128xf32>
    %cst_4 = arith.constant 0.000000e+00 : f32
    %cst_5 = arith.constant 1.000000e+00 : f32
    %12 = vector.broadcast %cst_4 : f32 to vector<1x128xf32>
    %13 = arith.maximumf %12, %11 : vector<1x128xf32>
    %14 = vector.broadcast %cst_5 : f32 to vector<1x128xf32>
    %15 = arith.minimumf %14, %13 : vector<1x128xf32>
    %cst_6 = arith.constant 1.500000e+01 : f32
    %16 = vector.broadcast %cst_6 : f32 to vector<1x128xf32>
    %17 = arith.mulf %15, %16 : vector<1x128xf32>
    %18 = vector.broadcast %10 : vector<1x128xf32> to vector<16x128xf32>
    %19 = arith.subf %1, %18 : vector<16x128xf32>
    %20 = math.absf %19 : vector<16x128xf32>
    %cst_7 = arith.constant 1.000000e+00 : f32
    %21 = vector.broadcast %cst_7 : f32 to vector<16x128xf32>
    %22 = arith.subf %21, %20 : vector<16x128xf32>
    %cst_8 = arith.constant 0.000000e+00 : f32
    %23 = vector.broadcast %cst_8 : f32 to vector<16x128xf32>
    %24 = arith.maximumf %23, %22 : vector<16x128xf32>
    %25 = vector.broadcast %17 : vector<1x128xf32> to vector<16x128xf32>
    %26 = arith.subf %1, %25 : vector<16x128xf32>
    %27 = math.absf %26 : vector<16x128xf32>
    %cst_9 = arith.constant 1.000000e+00 : f32
    %28 = vector.broadcast %cst_9 : f32 to vector<16x128xf32>
    %29 = arith.subf %28, %27 : vector<16x128xf32>
    %cst_10 = arith.constant 0.000000e+00 : f32
    %30 = vector.broadcast %cst_10 : f32 to vector<16x128xf32>
    %31 = arith.maximumf %30, %29 : vector<16x128xf32>
    %c0_11 = arith.constant 0 : index
    %c0_12 = arith.constant 0 : index
    %c0_13 = arith.constant 0 : index
    %32 = vector.load %arg2[%c0_11, %c0_12, %c0_13] : memref<3x256x16xf32, #tpu.memory_space<vmem>>, vector<1x256x16xf32>
    %33 = vector.shape_cast %32 : vector<1x256x16xf32> to vector<256x16xf32>
    %cst_14 = arith.constant dense<0.000000e+00> : vector<256x128xf32>
    %34 = tpu.matmul %33, %24, %cst_14 {dimension_numbers = #tpu.dot_dimension_numbers<[1], [0], [0], [1], [0, 0, 1, 1], [], []>} : vector<256x16xf32>, vector<16x128xf32>, vector<256x128xf32> -> vector<256x128xf32>
    %35 = vector.shape_cast %34 : vector<256x128xf32> to vector<16x16x128xf32>
    %36 = vector.shape_cast %31 : vector<16x128xf32> to vector<1x16x128xf32>
    %37 = vector.broadcast %36 : vector<1x16x128xf32> to vector<16x16x128xf32>
    %38 = arith.mulf %35, %37 : vector<16x16x128xf32>
    %cst_15 = arith.constant dense<0.000000e+00> : vector<16x128xf32>
    %39 = vector.multi_reduction <add>, %38, %cst_15 [1] : vector<16x16x128xf32> to vector<16x128xf32>
    %c0_16 = arith.constant 0 : index
    %c0_17 = arith.constant 0 : index
    %40 = vector.load %arg3[%c0_16, %c0_17] : memref<48x128xf32, #tpu.memory_space<vmem>>, vector<16x128xf32>
    tpu.vector_store %arg3[%c0_16, %c0_17], %39 {strides = array<i32>} : memref<48x128xf32, #tpu.memory_space<vmem>>, vector<16x128xf32>,
    %c1 = arith.constant 1 : index
    %c0_18 = arith.constant 0 : index
    %c0_19 = arith.constant 0 : index
    %41 = vector.load %arg1[%c1, %c0_18, %c0_19] : memref<3x2x128xf32, #tpu.memory_space<vmem>>, vector<1x2x128xf32>
    %42 = vector.shape_cast %41 : vector<1x2x128xf32> to vector<2x128xf32>
    %43 = vector.extract_strided_slice %42 {offsets = [0, 0], sizes = [1, 128], strides = [1, 1]} : vector<2x128xf32> to vector<1x128xf32>
    %cst_20 = arith.constant 0.000000e+00 : f32
    %cst_21 = arith.constant 1.000000e+00 : f32
    %44 = vector.broadcast %cst_20 : f32 to vector<1x128xf32>
    %45 = arith.maximumf %44, %43 : vector<1x128xf32>
    %46 = vector.broadcast %cst_21 : f32 to vector<1x128xf32>
    %47 = arith.minimumf %46, %45 : vector<1x128xf32>
    %cst_22 = arith.constant 1.500000e+01 : f32
    %48 = vector.broadcast %cst_22 : f32 to vector<1x128xf32>
    %49 = arith.mulf %47, %48 : vector<1x128xf32>
    %50 = vector.extract_strided_slice %42 {offsets = [1, 0], sizes = [1, 128], strides = [1, 1]} : vector<2x128xf32> to vector<1x128xf32>
    %cst_23 = arith.constant 0.000000e+00 : f32
    %cst_24 = arith.constant 1.000000e+00 : f32
    %51 = vector.broadcast %cst_23 : f32 to vector<1x128xf32>
    %52 = arith.maximumf %51, %50 : vector<1x128xf32>
    %53 = vector.broadcast %cst_24 : f32 to vector<1x128xf32>
    %54 = arith.minimumf %53, %52 : vector<1x128xf32>
    %cst_25 = arith.constant 1.500000e+01 : f32
    %55 = vector.broadcast %cst_25 : f32 to vector<1x128xf32>
    %56 = arith.mulf %54, %55 : vector<1x128xf32>
    %57 = vector.broadcast %49 : vector<1x128xf32> to vector<16x128xf32>
    %58 = arith.subf %1, %57 : vector<16x128xf32>
    %59 = math.absf %58 : vector<16x128xf32>
    %cst_26 = arith.constant 1.000000e+00 : f32
    %60 = vector.broadcast %cst_26 : f32 to vector<16x128xf32>
    %61 = arith.subf %60, %59 : vector<16x128xf32>
    %cst_27 = arith.constant 0.000000e+00 : f32
    %62 = vector.broadcast %cst_27 : f32 to vector<16x128xf32>
    %63 = arith.maximumf %62, %61 : vector<16x128xf32>
    %64 = vector.broadcast %56 : vector<1x128xf32> to vector<16x128xf32>
    %65 = arith.subf %1, %64 : vector<16x128xf32>
    %66 = math.absf %65 : vector<16x128xf32>
    %cst_28 = arith.constant 1.000000e+00 : f32
    %67 = vector.broadcast %cst_28 : f32 to vector<16x128xf32>
    %68 = arith.subf %67, %66 : vector<16x128xf32>
    %cst_29 = arith.constant 0.000000e+00 : f32
    %69 = vector.broadcast %cst_29 : f32 to vector<16x128xf32>
    %70 = arith.maximumf %69, %68 : vector<16x128xf32>
    %c1_30 = arith.constant 1 : index
    %c0_31 = arith.constant 0 : index
    %c0_32 = arith.constant 0 : index
    %71 = vector.load %arg2[%c1_30, %c0_31, %c0_32] : memref<3x256x16xf32, #tpu.memory_space<vmem>>, vector<1x256x16xf32>
    %72 = vector.shape_cast %71 : vector<1x256x16xf32> to vector<256x16xf32>
    %cst_33 = arith.constant dense<0.000000e+00> : vector<256x128xf32>
    %73 = tpu.matmul %72, %63, %cst_33 {dimension_numbers = #tpu.dot_dimension_numbers<[1], [0], [0], [1], [0, 0, 1, 1], [], []>} : vector<256x16xf32>, vector<16x128xf32>, vector<256x128xf32> -> vector<256x128xf32>
    %74 = vector.shape_cast %73 : vector<256x128xf32> to vector<16x16x128xf32>
    %75 = vector.shape_cast %70 : vector<16x128xf32> to vector<1x16x128xf32>
    %76 = vector.broadcast %75 : vector<1x16x128xf32> to vector<16x16x128xf32>
    %77 = arith.mulf %74, %76 : vector<16x16x128xf32>
    %cst_34 = arith.constant dense<0.000000e+00> : vector<16x128xf32>
    %78 = vector.multi_reduction <add>, %77, %cst_34 [1] : vector<16x16x128xf32> to vector<16x128xf32>
    %c16 = arith.constant 16 : index
    %c0_35 = arith.constant 0 : index
    %79 = vector.load %arg3[%c16, %c0_35] : memref<48x128xf32, #tpu.memory_space<vmem>>, vector<16x128xf32>
    tpu.vector_store %arg3[%c16, %c0_35], %78 {strides = array<i32>} : memref<48x128xf32, #tpu.memory_space<vmem>>, vector<16x128xf32>,
    %c2 = arith.constant 2 : index
    %c0_36 = arith.constant 0 : index
    %c0_37 = arith.constant 0 : index
    %80 = vector.load %arg1[%c2, %c0_36, %c0_37] : memref<3x2x128xf32, #tpu.memory_space<vmem>>, vector<1x2x128xf32>
    %81 = vector.shape_cast %80 : vector<1x2x128xf32> to vector<2x128xf32>
    %82 = vector.extract_strided_slice %81 {offsets = [0, 0], sizes = [1, 128], strides = [1, 1]} : vector<2x128xf32> to vector<1x128xf32>
    %cst_38 = arith.constant 0.000000e+00 : f32
    %cst_39 = arith.constant 1.000000e+00 : f32
    %83 = vector.broadcast %cst_38 : f32 to vector<1x128xf32>
    %84 = arith.maximumf %83, %82 : vector<1x128xf32>
    %85 = vector.broadcast %cst_39 : f32 to vector<1x128xf32>
    %86 = arith.minimumf %85, %84 : vector<1x128xf32>
    %cst_40 = arith.constant 1.500000e+01 : f32
    %87 = vector.broadcast %cst_40 : f32 to vector<1x128xf32>
    %88 = arith.mulf %86, %87 : vector<1x128xf32>
    %89 = vector.extract_strided_slice %81 {offsets = [1, 0], sizes = [1, 128], strides = [1, 1]} : vector<2x128xf32> to vector<1x128xf32>
    %cst_41 = arith.constant 0.000000e+00 : f32
    %cst_42 = arith.constant 1.000000e+00 : f32
    %90 = vector.broadcast %cst_41 : f32 to vector<1x128xf32>
    %91 = arith.maximumf %90, %89 : vector<1x128xf32>
    %92 = vector.broadcast %cst_42 : f32 to vector<1x128xf32>
    %93 = arith.minimumf %92, %91 : vector<1x128xf32>
    %cst_43 = arith.constant 1.500000e+01 : f32
    %94 = vector.broadcast %cst_43 : f32 to vector<1x128xf32>
    %95 = arith.mulf %93, %94 : vector<1x128xf32>
    %96 = vector.broadcast %88 : vector<1x128xf32> to vector<16x128xf32>
    %97 = arith.subf %1, %96 : vector<16x128xf32>
    %98 = math.absf %97 : vector<16x128xf32>
    %cst_44 = arith.constant 1.000000e+00 : f32
    %99 = vector.broadcast %cst_44 : f32 to vector<16x128xf32>
    %100 = arith.subf %99, %98 : vector<16x128xf32>
    %cst_45 = arith.constant 0.000000e+00 : f32
    %101 = vector.broadcast %cst_45 : f32 to vector<16x128xf32>
    %102 = arith.maximumf %101, %100 : vector<16x128xf32>
    %103 = vector.broadcast %95 : vector<1x128xf32> to vector<16x128xf32>
    %104 = arith.subf %1, %103 : vector<16x128xf32>
    %105 = math.absf %104 : vector<16x128xf32>
    %cst_46 = arith.constant 1.000000e+00 : f32
    %106 = vector.broadcast %cst_46 : f32 to vector<16x128xf32>
    %107 = arith.subf %106, %105 : vector<16x128xf32>
    %cst_47 = arith.constant 0.000000e+00 : f32
    %108 = vector.broadcast %cst_47 : f32 to vector<16x128xf32>
    %109 = arith.maximumf %108, %107 : vector<16x128xf32>
    %c2_48 = arith.constant 2 : index
    %c0_49 = arith.constant 0 : index
    %c0_50 = arith.constant 0 : index
    %110 = vector.load %arg2[%c2_48, %c0_49, %c0_50] : memref<3x256x16xf32, #tpu.memory_space<vmem>>, vector<1x256x16xf32>
    %111 = vector.shape_cast %110 : vector<1x256x16xf32> to vector<256x16xf32>
    %cst_51 = arith.constant dense<0.000000e+00> : vector<256x128xf32>
    %112 = tpu.matmul %111, %102, %cst_51 {dimension_numbers = #tpu.dot_dimension_numbers<[1], [0], [0], [1], [0, 0, 1, 1], [], []>} : vector<256x16xf32>, vector<16x128xf32>, vector<256x128xf32> -> vector<256x128xf32>
    %113 = vector.shape_cast %112 : vector<256x128xf32> to vector<16x16x128xf32>
    %114 = vector.shape_cast %109 : vector<16x128xf32> to vector<1x16x128xf32>
    %115 = vector.broadcast %114 : vector<1x16x128xf32> to vector<16x16x128xf32>
    %116 = arith.mulf %113, %115 : vector<16x16x128xf32>
    %cst_52 = arith.constant dense<0.000000e+00> : vector<16x128xf32>
    %117 = vector.multi_reduction <add>, %116, %cst_52 [1] : vector<16x16x128xf32> to vector<16x128xf32>
    %c32 = arith.constant 32 : index
    %c0_53 = arith.constant 0 : index
    %118 = vector.load %arg3[%c32, %c0_53] : memref<48x128xf32, #tpu.memory_space<vmem>>, vector<16x128xf32>
    tpu.vector_store %arg3[%c32, %c0_53], %117 {strides = array<i32>} : memref<48x128xf32, #tpu.memory_space<vmem>>, vector<16x128xf32>,
    return
  }
  func.func @transform_0(%arg0: i32) -> (i32, i32, i32) {
    %c0_i32 = arith.constant 0 : i32
    %c0_i32_0 = arith.constant 0 : i32
    %c0_i32_1 = arith.constant 0 : i32
    return %c0_i32, %c0_i32_0, %arg0 : i32, i32, i32
  }
  func.func @transform_1(%arg0: i32) -> (i32, i32, i32) {
    %c0_i32 = arith.constant 0 : i32
    %c0_i32_0 = arith.constant 0 : i32
    %c0_i32_1 = arith.constant 0 : i32
    %c0_i32_2 = arith.constant 0 : i32
    return %c0_i32, %c0_i32_0, %c0_i32_1 : i32, i32, i32
  }
  func.func @transform_2(%arg0: i32) -> (i32, i32) {
    %c0_i32 = arith.constant 0 : i32
    %c0_i32_0 = arith.constant 0 : i32
    return %c0_i32, %arg0 : i32, i32
  }
}

</mosaic_0001>

<bundles_post_ra>
// kernel: tpu_custom_call.1
= control target key start
LH: loop header
LB: loop body
LE: loop exit
PB: predicated region body
PF: predicated region fallthrough
CT: control target
= control target key end

     0   :  { %7 = vsyncpa [#allocation4], 0  ;;  %s3333_s0 = inlined_call_operand.vmem [shape: f32[3,2,256], index: 0, kind: input, shape index: {}]   ;;  %s3334_s1 = inlined_call_operand.vmem [shape: f32[3,256,16], index: 1, kind: input, shape index: {}]   ;;  %s3335_s2 = inlined_call_operand.hbm [shape: f32[48,256], index: 2, kind: output, shape index: {}]  }
   0x1   :  { %9 = vsyncpa [#allocation4 + $0x1], 0  ;;  %s2528_s9 = smov 0   ;;  %s2530_s10 = smov 0  }
   0x2   :  { %s2532_s11 = smov 0   ;;  %s2534_s12 = smov 0  }
   0x3 LB: > { %s1957_s13 = sadd.s32 4294967295, %s2507_s12   ;;  %s1958_s14 = sadd.s32 4294967294, %s2507_s12   ;;  %s2507_s12 = sphi %s2534_s12, %s3341_s12   ;;  %s2503_s11 = sphi %s2532_s11, %s3340_s11   ;;  %s2499_s10 = sphi %s2530_s10, %s3339_s10   ;;  %s2495_s9 = sphi %s2528_s9, %s3338_s9  }
   0x4   : > { %s2551_s15 = sadd.s32 1, %s2507_s12   ;;  %s22_s16 = sadd.s32 1, %s2503_s11 }
   0x5   : > { %s19_s17 = ssub.s32 %s2507_s12, %s2551_s15  ;;  %p29_p0 = scmp.ne.s32.totalorder %s2503_s11, %s2499_s10 }
   0x6   : > { %p20_p1 = scmp.eq.s32.totalorder %s19_s17, 0  ;;  %p30_p2 = scmp.eq.s32.totalorder %s2507_s12, 0 }
   0x7   : > { %p80_p3 = scmp.eq.s32.totalorder %s1957_s13, 1  ;;  %p85_p4 = scmp.ne.s32.totalorder %s2499_s10, %s2495_s9 }
   0x8   : > { %s2564_s18 = scalar_select %p20_p1, %s2503_s11, %s22_s16  }
   0x9   : > { %p31_p5 = por %p30_p2, %p29_p0  ;;  %p2566_p6 = por %p80_p3, %p29_p0 }
   0xa   : > { %p86_p7 = scmp.eq.s32.totalorder %s1958_s14, 1  ;;  %p1960_p9 = scmp.ge.s32.totalorder %s2507_s12, 2 }
   0xc   : > { %p2570_p8 = por %p86_p7, %p85_p4  ;;  %105 = sbr.rel (%p1960_p9) target bundleno = 26 (0x1a), region = 20 }
  0x13   : > { %108 = sbr.rel (!%p31_p5) target bundleno = 26 (0x1a), region = 24  ;;  %s110_s21 = sand.u32 (%p31_p5), 1, %s2503_s11  }
  0x14   : > { %s1961_s22 = sshll.u32 (%p31_p5), %s2507_s12, 1  ;;  %s2400_s23 = smul.u32 (%p31_p5), 6, %s110_s21 }
  0x15   : > { %s114_s26 = scalar_lea.vmem (%p31_p5), %s3333_s0, %s1961_s22 }
  0x16   : > { %v130_v0 = vld [vmem:[%s114_s26] sm:$0x3] (%p31_p5)  ;;  %v132_v1 = vld [vmem:[%s114_s26 + $0x4] sm:$0x3] (%p31_p5)  ;;  %v134_v2 = vld [vmem:[%s114_s26 + $0x8] sm:$0x3] (%p31_p5) }
  0x17   : > { %s112_s27 = scalar_lea.vmem (%p31_p5), [#allocation2], %s2400_s23 }
  0x18   : > { %131 = vst [vmem:[%s112_s27] sm:$0x3] (%p31_p5), %v130_v0  ;;  %133 = vst [vmem:[%s112_s27 + $0x2] sm:$0x3] (%p31_p5), %v132_v1 }
  0x19   : > { %135 = vst [vmem:[%s112_s27 + $0x4] sm:$0x3] (%p31_p5), %v134_v2 }
  0x1a PF: > { %p1962_p10 = scmp.ge.s32.totalorder %s2507_s12, 1  ;;  %p155_p11 = scmp.lt.s32.totalorder %s2507_s12, 3 }
  0x1c   : > { %p156_p12 = pnand %p1962_p10, %p155_p11 }
  0x1d   : > { %s2585_s28 = sand.u32 (!%p156_p12), 1, %s2499_s10   ;;  %v183_v3 = vlaneseq (!%p156_p12)  ;;  %v216_v4 = vld [vmem:[%s3334_s1] sm:$0xff] (!%p156_p12)  ;;  %vm248_vm0 = vcmask (!%p156_p12), 130048   ;;  %v217_v56 = vld [vmem:[%s3334_s1 + $0x8] sm:$0xff] (!%p156_p12)  ;;  %v218_v59 = vld [vmem:[%s3334_s1 + $0x10] sm:$0xff] (!%p156_p12)  ;;  %vm730_vm1 = vcmask (!%p156_p12), 1041409  }
  0x1e   : > { %159 = sbr.rel (%p156_p12) target bundleno = 415 (0x19f), region = 58  ;;  %v232_v5 = vld [vmem:[%s3334_s1 + $0x80] sm:$0xff] (!%p156_p12)  ;;  %2234 = vmatprep.mubr.msk.f32.mxu0 (!%p156_p12), %vm248_vm0, %v216_v4  ;;  %v233_v57 = vld [vmem:[%s3334_s1 + $0x88] sm:$0xff] (!%p156_p12)  ;;  %v234_v60 = vld [vmem:[%s3334_s1 + $0x90] sm:$0xff] (!%p156_p12)  ;;  %vm732_vm2 = vcmask (!%p156_p12), 1042434   ;;  %vm734_vm3 = vcmask (!%p156_p12), 1043459  }
  0x1f   : > { %s2401_s5 = smul.u32 (!%p156_p12), 6, %s2585_s28  ;;  %2258 = vmatprep.mubr.msk.f32.mxu1 (!%p156_p12), %vm248_vm0, %v232_v5  ;;  %v184_v6 = vshrl.u32 (!%p156_p12), %v183_v3, 7  ;;  %v219_v61 = vld [vmem:[%s3334_s1 + $0x18] sm:$0xff] (!%p156_p12)  ;;  %v220_v63 = vld [vmem:[%s3334_s1 + $0x20] sm:$0xff] (!%p156_p12)  ;;  %v221_v1 = vld [vmem:[%s3334_s1 + $0x28] sm:$0xff] (!%p156_p12)  ;;  %vm736_vm4 = vcmask (!%p156_p12), 1044484  }
  0x20   : > { %v235_v62 = vld [vmem:[%s3334_s1 + $0x98] sm:$0xff] (!%p156_p12)  ;;  %v236_v0 = vld [vmem:[%s3334_s1 + $0xa0] sm:$0xff] (!%p156_p12)  ;;  %v237_v2 = vld [vmem:[%s3334_s1 + $0xa8] sm:$0xff] (!%p156_p12)  ;;  %vm738_vm5 = vcmask (!%p156_p12), 1045509   ;;  %vm740_vm6 = vcmask (!%p156_p12), 1046534   ;;  %vm742_vm7 = vcmask (!%p156_p12), 1047559  }
  0x21   : > { %s164_s6 = scalar_lea.vmem (!%p156_p12), [#allocation2], %s2401_s5  ;;  %v185_v8 = vadd.s32 (!%p156_p12), 8, %v184_v6  ;;  %v194_v15 = vsub.s32 (!%p156_p12), 0, %v184_v6  ;;  %v206_v16 = vsub.s32 (!%p156_p12), 1, %v184_v6  ;;  %v2596_v19 = vcvt.s32.f32 (!%p156_p12), %v184_v6  ;;  %v222_v3 = vld [vmem:[%s3334_s1 + $0x30] sm:$0xff] (!%p156_p12)  ;;  %v223_v5 = vld [vmem:[%s3334_s1 + $0x38] sm:$0xff] (!%p156_p12) }
  0x22   : > { %v188_v7 = vld [vmem:[%s164_s6] sm:$0x3] (!%p156_p12)  ;;  %v1995_v10 = vld [vmem:[%s164_s6 + $0x2] sm:$0x3] (!%p156_p12)  ;;  %v2060_v11 = vld [vmem:[%s164_s6 + $0x4] sm:$0x3] (!%p156_p12) }
  0x23   : > { %v189_v9 = vmax.f32 (!%p156_p12), %v188_v7, 0.0  ;;  %v757_v12 = vmax.f32 (!%p156_p12), %v1995_v10, 0.0  ;;  %v1318_v13 = vmax.f32 (!%p156_p12), %v2060_v11, 0.0  ;;  %v2598_v20 = vcvt.s32.f32 (!%p156_p12), %v185_v8  ;;  %v238_v4 = vld [vmem:[%s3334_s1 + $0xb0] sm:$0xff] (!%p156_p12)  ;;  %v239_v6 = vld [vmem:[%s3334_s1 + $0xb8] sm:$0xff] (!%p156_p12)  ;;  %v224_v7 = vld [vmem:[%s3334_s1 + $0x40] sm:$0xff] (!%p156_p12) }
  0x24   : > { %v240_v8 = vld [vmem:[%s3334_s1 + $0xc0] sm:$0xff] (!%p156_p12)  ;;  %v241_v10 = vld [vmem:[%s3334_s1 + $0xc8] sm:$0xff] (!%p156_p12)  ;;  %v226_v11 = vld [vmem:[%s3334_s1 + $0x50] sm:$0xff] (!%p156_p12)  ;;  %s2402_s24 = smul.u32 (!%p156_p12), 48, %s2585_s28  ;;  %s2125_s26 = sshll.u32 (!%p156_p12), %s1957_s13, 7 }
  0x25   : > { %v190_v14 = vmin.f32 %v189_v9, 1.0  ;;  %v758_v17 = vmin.f32 %v757_v12, 1.0  ;;  %v1319_v18 = vmin.f32 %v1318_v13, 1.0  ;;  %v225_v9 = vld [vmem:[%s3334_s1 + $0x48] sm:$0xff]  ;;  %v242_v12 = vld [vmem:[%s3334_s1 + $0xd0] sm:$0xff]  ;;  %v227_v13 = vld [vmem:[%s3334_s1 + $0x58] sm:$0xff]  ;;  %s3283_s3 = scalar_lea.hbm %s3335_s2, %s2125_s26 }
  0x26   : > { %s3073_s25 = scalar_lea.vmem [#allocation3], %s2402_s24  ;;  %s1878_s13 = scalar_lea.sflag [#allocation4], %s2585_s28 }
  0x27   : > { %v191_v21 = vmul.f32 15.0, %v190_v14  ;;  %v759_v22 = vmul.f32 15.0, %v758_v17  ;;  %v1320_v23 = vmul.f32 15.0, %v1319_v18  ;;  %v243_v14 = vld [vmem:[%s3334_s1 + $0xd8] sm:$0xff]  ;;  %v229_v17 = vld [vmem:[%s3334_s1 + $0x68] sm:$0xff]  ;;  %s1890_s27 = sshll.u32 %s3073_s25, 4  ;;  %s3285_s27 = int_to_ptr.vmem [resolvable:$true] %s1890_s27 }
  0x28   : > { %v245_v18 = vld [vmem:[%s3334_s1 + $0xe8] sm:$0xff]  ;;  %s2445_s4 = scalar_lea.vmem %s3285_s27, 768  ;;  %s2509_s5 = smov [#allocation3]  }
  0x29   : > { %v195_v24 = vrot.slane %v191_v21, %v194_v15  ;;  %v2600_v25 = vrot.slane %v191_v21, %v206_v16  ;;  %v763_v26 = vrot.slane %v759_v22, %v194_v15  ;;  %v2602_v27 = vrot.slane %v759_v22, %v206_v16  ;;  %v230_v21 = vld [vmem:[%s3334_s1 + $0x70] sm:$0xff]  ;;  %p2446_p13 = scmp.ne.s32.totalorder %s3285_s27, %s2445_s4  ;;  %s2449_s6 = sshll.u32 %s2509_s5, 4  ;;  %s2450_s6 = int_to_ptr.vmem [resolvable:$false] %s2449_s6 }
  0x2a   : > { %v1324_v28 = vrot.slane %v1320_v23, %v194_v15  ;;  %v2604_v29 = vrot.slane %v1320_v23, %v206_v16  ;;  %v228_v15 = vld [vmem:[%s3334_s1 + $0x60] sm:$0xff]  ;;  %v246_v22 = vld [vmem:[%s3334_s1 + $0xf0] sm:$0xff]  ;;  %v231_v23 = vld [vmem:[%s3334_s1 + $0x78] sm:$0xff]  ;;  %s2451_s7 = scalar_lea.vmem %s2450_s6, 1536  ;;  %p2452_p2 = scmp.lt.s32.totalorder %s3285_s27, %s2450_s6 }
  0x2b   : > { %v196_v30 = vsub.f32 %v2596_v19, %v195_v24  ;;  %v197_v31 = vsub.f32 %v2598_v20, %v195_v24  ;;  %v764_v32 = vsub.f32 %v2596_v19, %v763_v26  ;;  %v765_v33 = vsub.f32 %v2598_v20, %v763_v26  ;;  %v244_v16 = vld [vmem:[%s3334_s1 + $0xe0] sm:$0xff]  ;;  %v247_v24 = vld [vmem:[%s3334_s1 + $0xf8] sm:$0xff]  ;;  %p2447_p0 = pnand %p2446_p13, %p2566_p6  ;;  %p2453_p3 = scmp.lt.s32.totalorder %s2451_s7, %s2445_s4 }
  0x2c   : > { %v1325_v34 = vsub.f32 %v2596_v19, %v1324_v28  ;;  %v1326_v35 = vsub.f32 %v2598_v20, %v1324_v28  ;;  %v1996_v26 = vld [vmem:[%s3334_s1 + $0x100] sm:$0xff] }
  0x2d   : > { %v198_v36 = vand.u32 2147483647, %v196_v30  ;;  %v199_v37 = vand.u32 2147483647, %v197_v31  ;;  %v766_v38 = vand.u32 2147483647, %v764_v32  ;;  %p2448_p1 = pneg %p2447_p0  ;;  %p2454_p4 = por %p2453_p3, %p2452_p2 }
  0x2e   : > { %v767_v39 = vand.u32 2147483647, %v765_v33  ;;  %v1327_v42 = vand.u32 2147483647, %v1325_v34  ;;  %v1328_v45 = vand.u32 2147483647, %v1326_v35 }
  0x2f   : > { %v200_v40 = vsub.f32 1.0, %v198_v36  ;;  %v201_v41 = vsub.f32 1.0, %v199_v37  ;;  %v768_v43 = vsub.f32 1.0, %v766_v38  ;;  %v2061_v28 = vld [vmem:[%s3334_s1 + $0x200] sm:$0xff]  ;;  %v1997_v30 = vld [vmem:[%s3334_s1 + $0x108] sm:$0xff]  ;;  %v1998_v32 = vld [vmem:[%s3334_s1 + $0x110] sm:$0xff]  ;;  %p2455_p5 = pnand %p2454_p4, %p2448_p1 }
  0x30   : > { %v769_v44 = vsub.f32 1.0, %v767_v39  ;;  %v1329_v48 = vsub.f32 1.0, %v1327_v42  ;;  %v1330_v51 = vsub.f32 1.0, %v1328_v45  ;;  %v2062_v31 = vld [vmem:[%s3334_s1 + $0x208] sm:$0xff]  ;;  %v2063_v33 = vld [vmem:[%s3334_s1 + $0x210] sm:$0xff]  ;;  %v1999_v34 = vld [vmem:[%s3334_s1 + $0x118] sm:$0xff] }
  0x31   : > { %v202_v46 = vmax.f32 %v200_v40, 0.0  ;;  %v203_v47 = vmax.f32 %v201_v41, 0.0  ;;  %v770_v49 = vmax.f32 %v768_v43, 0.0  ;;  %v2064_v35 = vld [vmem:[%s3334_s1 + $0x218] sm:$0xff]  ;;  %v2000_v36 = vld [vmem:[%s3334_s1 + $0x120] sm:$0xff]  ;;  %v2001_v38 = vld [vmem:[%s3334_s1 + $0x128] sm:$0xff] }
  0x32   : > { %v771_v50 = vmax.f32 %v769_v44, 0.0  ;;  %v1331_v53 = vmax.f32 %v1329_v48, 0.0  ;;  %v1332_v55 = vmax.f32 %v1330_v51, 0.0  ;;  %v2065_v37 = vld [vmem:[%s3334_s1 + $0x220] sm:$0xff]  ;;  %v2066_v39 = vld [vmem:[%s3334_s1 + $0x228] sm:$0xff]  ;;  %v2002_v40 = vld [vmem:[%s3334_s1 + $0x130] sm:$0xff] }
  0x33   : > { %v2386_v52 = vpack.c.bf16 %v203_v47, %v202_v46  ;;  %v2067_v41 = vld [vmem:[%s3334_s1 + $0x230] sm:$0xff]  ;;  %v2003_v42 = vld [vmem:[%s3334_s1 + $0x138] sm:$0xff]  ;;  %v2004_v44 = vld [vmem:[%s3334_s1 + $0x140] sm:$0xff] }
  0x34   : > { %v2390_v54 = vpack.c.bf16 %v771_v50, %v770_v49  ;;  %v2394_v58 = vpack.c.bf16 %v1332_v55, %v1331_v53  ;;  %v2068_v43 = vld [vmem:[%s3334_s1 + $0x238] sm:$0xff]  ;;  %v2069_v45 = vld [vmem:[%s3334_s1 + $0x240] sm:$0xff]  ;;  %v2005_v46 = vld [vmem:[%s3334_s1 + $0x148] sm:$0xff] }
  0x35   : > { %2387 = vmatprep.subr.bf16.mxu0 %v2386_v52  ;;  %2398 = vmatprep.subr.bf16.mxu1 %v2386_v52  ;;  %v2070_v47 = vld [vmem:[%s3334_s1 + $0x248] sm:$0xff]  ;;  %v2006_v48 = vld [vmem:[%s3334_s1 + $0x150] sm:$0xff]  ;;  %v2007_v50 = vld [vmem:[%s3334_s1 + $0x158] sm:$0xff] }
  0x36   : > { %2389 = vmatpush3.bf16.msra.mxu0 %v2386_v52  ;;  %2399 = vmatpush3.bf16.msra.mxu1 %v2386_v52  ;;  %v2071_v49 = vld [vmem:[%s3334_s1 + $0x250] sm:$0xff]  ;;  %v2072_v51 = vld [vmem:[%s3334_s1 + $0x258] sm:$0xff]  ;;  %v2008_v52 = vld [vmem:[%s3334_s1 + $0x160] sm:$0xff] }
  0x37   : > { %2391 = vmatprep.subr.bf16.mxu1 %v2390_v54  ;;  %2395 = vmatprep.subr.bf16.mxu0 %v2394_v58  ;;  %v2073_v53 = vld [vmem:[%s3334_s1 + $0x260] sm:$0xff]  ;;  %v2074_v55 = vld [vmem:[%s3334_s1 + $0x268] sm:$0xff] }
  0x39   : > { %2235 = vmatmul.mubr.msk.f32.vlgmr.msra.gmra.mrb[0].mxu0 %vm248_vm0, %v217_v56  ;;  %2259 = vmatmul.mubr.msk.f32.vlgmr.msra.gmra.mrb[0].mxu1 %vm248_vm0, %v233_v57  ;;  %v2010_v56 = vld [vmem:[%s3334_s1 + $0x170] sm:$0xff] }
  0x3a   : > { %2393 = vmatpush3.bf16.msra.mxu1 %v2390_v54  ;;  %2397 = vmatpush3.bf16.msra.mxu0 %v2394_v58  ;;  %v2009_v54 = vld [vmem:[%s3334_s1 + $0x168] sm:$0xff]  ;;  %v2075_v57 = vld [vmem:[%s3334_s1 + $0x270] sm:$0xff]  ;;  %v2011_v58 = vld [vmem:[%s3334_s1 + $0x178] sm:$0xff] }
  0x3b   : > { %2237 = vmatprep.mubr.msk.f32.mxu0 %vm248_vm0, %v218_v59  ;;  %2261 = vmatprep.mubr.msk.f32.mxu1 %vm248_vm0, %v234_v60  ;;  %v2076_v59 = vld [vmem:[%s3334_s1 + $0x278] sm:$0xff]  ;;  %v2012_v60 = vld [vmem:[%s3334_s1 + $0x180] sm:$0xff] }
  0x3d   : > { %2238 = vmatmul.mubr.msk.f32.gmra.mrb[2].mxu0 %vm248_vm0, %v219_v61  ;;  %2262 = vmatmul.mubr.msk.f32.gmra.mrb[2].mxu1 %vm248_vm0, %v235_v62  ;;  %v2077_v61 = vld [vmem:[%s3334_s1 + $0x280] sm:$0xff]  ;;  %v2013_v62 = vld [vmem:[%s3334_s1 + $0x188] sm:$0xff] }
  0x3e   : > { %2240 = vmatprep.mubr.msk.f32.mxu0 %vm248_vm0, %v220_v63  ;;  %2264 = vmatprep.mubr.msk.f32.mxu1 %vm248_vm0, %v236_v0  ;;  %v2078_v63 = vld [vmem:[%s3334_s1 + $0x288] sm:$0xff]  ;;  %v2014_v0 = vld [vmem:[%s3334_s1 + $0x190] sm:$0xff] }
  0x41   : > { %2241 = vmatmul.mubr.msk.f32.gmra.mrb[4].mxu0 %vm248_vm0, %v221_v1  ;;  %2265 = vmatmul.mubr.msk.f32.gmra.mrb[4].mxu1 %vm248_vm0, %v237_v2  ;;  %v2079_v1 = vld [vmem:[%s3334_s1 + $0x290] sm:$0xff]  ;;  %v2015_v2 = vld [vmem:[%s3334_s1 + $0x198] sm:$0xff] }
  0x42   : > { %2243 = vmatprep.mubr.msk.f32.mxu0 %vm248_vm0, %v222_v3  ;;  %2267 = vmatprep.mubr.msk.f32.mxu1 %vm248_vm0, %v238_v4  ;;  %v2080_v3 = vld [vmem:[%s3334_s1 + $0x298] sm:$0xff]  ;;  %v2016_v4 = vld [vmem:[%s3334_s1 + $0x1a0] sm:$0xff] }
  0x45   : > { %2244 = vmatmul.mubr.msk.f32.gmra.mrb[6].mxu0 %vm248_vm0, %v223_v5  ;;  %2268 = vmatmul.mubr.msk.f32.gmra.mrb[6].mxu1 %vm248_vm0, %v239_v6  ;;  %v2081_v5 = vld [vmem:[%s3334_s1 + $0x2a0] sm:$0xff]  ;;  %v2017_v6 = vld [vmem:[%s3334_s1 + $0x1a8] sm:$0xff] }
  0x46   : > { %2246 = vmatprep.mubr.msk.f32.mxu0 %vm248_vm0, %v224_v7  ;;  %2270 = vmatprep.mubr.msk.f32.mxu1 %vm248_vm0, %v240_v8  ;;  %v2082_v7 = vld [vmem:[%s3334_s1 + $0x2a8] sm:$0xff]  ;;  %v2018_v8 = vld [vmem:[%s3334_s1 + $0x1b0] sm:$0xff] }
  0x49   : > { %2247 = vmatmul.mubr.msk.f32.gmra.mrb[8].mxu0 %vm248_vm0, %v225_v9  ;;  %2271 = vmatmul.mubr.msk.f32.gmra.mrb[8].mxu1 %vm248_vm0, %v241_v10  ;;  %v2083_v9 = vld [vmem:[%s3334_s1 + $0x2b0] sm:$0xff]  ;;  %v2019_v10 = vld [vmem:[%s3334_s1 + $0x1b8] sm:$0xff] }
  0x4a   : > { %2249 = vmatprep.mubr.msk.f32.mxu0 %vm248_vm0, %v226_v11  ;;  %2273 = vmatprep.mubr.msk.f32.mxu1 %vm248_vm0, %v242_v12  ;;  %v2084_v11 = vld [vmem:[%s3334_s1 + $0x2b8] sm:$0xff]  ;;  %v2020_v12 = vld [vmem:[%s3334_s1 + $0x1c0] sm:$0xff] }
  0x4d   : > { %2250 = vmatmul.mubr.msk.f32.gmra.mrb[10].mxu0 %vm248_vm0, %v227_v13  ;;  %2274 = vmatmul.mubr.msk.f32.gmra.mrb[10].mxu1 %vm248_vm0, %v243_v14  ;;  %v2085_v13 = vld [vmem:[%s3334_s1 + $0x2c0] sm:$0xff]  ;;  %v2021_v14 = vld [vmem:[%s3334_s1 + $0x1c8] sm:$0xff] }
  0x4e   : > { %2252 = vmatprep.mubr.msk.f32.mxu0 %vm248_vm0, %v228_v15  ;;  %2276 = vmatprep.mubr.msk.f32.mxu1 %vm248_vm0, %v244_v16  ;;  %v2086_v15 = vld [vmem:[%s3334_s1 + $0x2c8] sm:$0xff]  ;;  %v2022_v16 = vld [vmem:[%s3334_s1 + $0x1d0] sm:$0xff] }
  0x51   : > { %2253 = vmatmul.mubr.msk.f32.gmra.mrb[12].mxu0 %vm248_vm0, %v229_v17  ;;  %2277 = vmatmul.mubr.msk.f32.gmra.mrb[12].mxu1 %vm248_vm0, %v245_v18  ;;  %v2087_v17 = vld [vmem:[%s3334_s1 + $0x2d0] sm:$0xff]  ;;  %v2023_v18 = vld [vmem:[%s3334_s1 + $0x1d8] sm:$0xff] }
  0x52   : > { %2255 = vmatprep.mubr.msk.f32.mxu0 %vm248_vm0, %v230_v21  ;;  %2279 = vmatprep.mubr.msk.f32.mxu1 %vm248_vm0, %v246_v22  ;;  %v2088_v21 = vld [vmem:[%s3334_s1 + $0x2d8] sm:$0xff]  ;;  %v2024_v22 = vld [vmem:[%s3334_s1 + $0x1e0] sm:$0xff] }
  0x55   : > { %2256 = vmatmul.mubr.msk.f32.gmra.mrb[14].mxu0 %vm248_vm0, %v231_v23  ;;  %2280 = vmatmul.mubr.msk.f32.gmra.mrb[14].mxu1 %vm248_vm0, %v247_v24  ;;  %v2089_v23 = vld [vmem:[%s3334_s1 + $0x2e0] sm:$0xff]  ;;  %v2025_v24 = vld [vmem:[%s3334_s1 + $0x1e8] sm:$0xff] }
  0x56   : > { %2286 = vmatprep.mubr.msk.f32.mxu1 %vm248_vm0, %v1996_v26  ;;  %2338 = vmatprep.mubr.msk.f32.mxu0 %vm248_vm0, %v2061_v28  ;;  %v2090_v26 = vld [vmem:[%s3334_s1 + $0x2e8] sm:$0xff]  ;;  %v2026_v28 = vld [vmem:[%s3334_s1 + $0x1f0] sm:$0xff] }
  0x59   : > { %2287 = vmatmul.mubr.msk.f32.vlgmr.msra.gmra.mrb[16].mxu1 %vm248_vm0, %v1997_v30  ;;  %2339 = vmatmul.mubr.msk.f32.vlgmr.msra.gmra.mrb[16].mxu0 %vm248_vm0, %v2062_v31  ;;  %v2091_v30 = vld [vmem:[%s3334_s1 + $0x2f0] sm:$0xff]  ;;  %v2027_v31 = vld [vmem:[%s3334_s1 + $0x1f8] sm:$0xff] }
  0x5a   : > { %2289 = vmatprep.mubr.msk.f32.mxu1 %vm248_vm0, %v1998_v32  ;;  %2341 = vmatprep.mubr.msk.f32.mxu0 %vm248_vm0, %v2063_v33  ;;  %v2092_v32 = vld [vmem:[%s3334_s1 + $0x2f8] sm:$0xff]  ;;  %v209_v33 = vsub.f32 %v2598_v20, %v2600_v25 }
  0x5d   : > { %2290 = vmatmul.mubr.msk.f32.gmra.mrb[18].mxu1 %vm248_vm0, %v1999_v34  ;;  %2342 = vmatmul.mubr.msk.f32.gmra.mrb[18].mxu0 %vm248_vm0, %v2064_v35  ;;  %v208_v34 = vsub.f32 %v2596_v19, %v2600_v25  ;;  %v211_v35 = vand.u32 2147483647, %v209_v33  ;;  %v1337_v25 = vsub.f32 %v2596_v19, %v2604_v29 }
  0x5e   : > { %2292 = vmatprep.mubr.msk.f32.mxu1 %vm248_vm0, %v2000_v36  ;;  %2344 = vmatprep.mubr.msk.f32.mxu0 %vm248_vm0, %v2065_v37 }
  0x5f   : > { %v210_v36 = vand.u32 2147483647, %v208_v34  ;;  %v213_v37 = vsub.f32 1.0, %v211_v35 }
  0x61   : > { %2293 = vmatmul.mubr.msk.f32.gmra.mrb[20].mxu1 %vm248_vm0, %v2001_v38  ;;  %2345 = vmatmul.mubr.msk.f32.gmra.mrb[20].mxu0 %vm248_vm0, %v2066_v39  ;;  %v212_v38 = vsub.f32 1.0, %v210_v36  ;;  %v2992_v39 = vmax.f32 %v213_v37, 0.0 }
  0x62   : > { %2295 = vmatprep.mubr.msk.f32.mxu1 %vm248_vm0, %v2002_v40  ;;  %2347 = vmatprep.mubr.msk.f32.mxu0 %vm248_vm0, %v2067_v41  ;;  %v777_v40 = vsub.f32 %v2598_v20, %v2602_v27  ;;  %v1338_v41 = vsub.f32 %v2598_v20, %v2604_v29 }
  0x65   : > { %2296 = vmatmul.mubr.msk.f32.gmra.mrb[22].mxu1 %vm248_vm0, %v2003_v42  ;;  %2348 = vmatmul.mubr.msk.f32.gmra.mrb[22].mxu0 %vm248_vm0, %v2068_v43  ;;  %v2998_v42 = vmax.f32 %v212_v38, 0.0  ;;  %v776_v43 = vsub.f32 %v2596_v19, %v2602_v27 }
  0x66   : > { %2298 = vmatprep.mubr.msk.f32.mxu1 %vm248_vm0, %v2004_v44  ;;  %2350 = vmatprep.mubr.msk.f32.mxu0 %vm248_vm0, %v2069_v45 }
  0x69   : > { %2299 = vmatmul.mubr.msk.f32.gmra.mrb[24].mxu1 %vm248_vm0, %v2005_v46  ;;  %2351 = vmatmul.mubr.msk.f32.gmra.mrb[24].mxu0 %vm248_vm0, %v2070_v47 }
  0x6a   : > { %2301 = vmatprep.mubr.msk.f32.mxu1 %vm248_vm0, %v2006_v48  ;;  %2353 = vmatprep.mubr.msk.f32.mxu0 %vm248_vm0, %v2071_v49 }
  0x6d   : > { %2302 = vmatmul.mubr.msk.f32.gmra.mrb[26].mxu1 %vm248_vm0, %v2007_v50  ;;  %2354 = vmatmul.mubr.msk.f32.gmra.mrb[26].mxu0 %vm248_vm0, %v2072_v51  ;;  %v779_v50 = vand.u32 2147483647, %v777_v40  ;;  %v1340_v51 = vand.u32 2147483647, %v1338_v41 }
  0x6e   : > { %2304 = vmatprep.mubr.msk.f32.mxu1 %vm248_vm0, %v2008_v52  ;;  %2356 = vmatprep.mubr.msk.f32.mxu0 %vm248_vm0, %v2073_v53  ;;  %v778_v53 = vand.u32 2147483647, %v776_v43 }
  0x71   : > { %2305 = vmatmul.mubr.msk.f32.gmra.mrb[28].mxu1 %vm248_vm0, %v2009_v54  ;;  %2357 = vmatmul.mubr.msk.f32.gmra.mrb[28].mxu0 %vm248_vm0, %v2074_v55  ;;  %v1339_v54 = vand.u32 2147483647, %v1337_v25 }
  0x72   : > { %2307 = vmatprep.mubr.msk.f32.mxu1 %vm248_vm0, %v2010_v56  ;;  %2359 = vmatprep.mubr.msk.f32.mxu0 %vm248_vm0, %v2075_v57 }
  0x75   : > { %2308 = vmatmul.mubr.msk.f32.gmra.mrb[30].mxu1 %vm248_vm0, %v2011_v58  ;;  %2360 = vmatmul.mubr.msk.f32.gmra.mrb[30].mxu0 %vm248_vm0, %v2076_v59 }
  0x76   : > { %2310 = vmatprep.mubr.msk.f32.mxu1 %vm248_vm0, %v2012_v60  ;;  %2362 = vmatprep.mubr.msk.f32.mxu0 %vm248_vm0, %v2077_v61  ;;  %v781_v60 = vsub.f32 1.0, %v779_v50  ;;  %v1342_v61 = vsub.f32 1.0, %v1340_v51 }
  0x79   : > { %2311 = vmatmul.mubr.msk.f32.gmra.mrb[32].mxu1 %vm248_vm0, %v2013_v62  ;;  %2363 = vmatmul.mubr.msk.f32.gmra.mrb[32].mxu0 %vm248_vm0, %v2078_v63 }
  0x7a   : > { %2313 = vmatprep.mubr.msk.f32.mxu1 %vm248_vm0, %v2014_v0  ;;  %2365 = vmatprep.mubr.msk.f32.mxu0 %vm248_vm0, %v2079_v1 }
  0x7d   : > { %2314 = vmatmul.mubr.msk.f32.gmra.mrb[34].mxu1 %vm248_vm0, %v2015_v2  ;;  %2366 = vmatmul.mubr.msk.f32.gmra.mrb[34].mxu0 %vm248_vm0, %v2080_v3  ;;  %v780_v2 = vsub.f32 1.0, %v778_v53  ;;  %v1341_v3 = vsub.f32 1.0, %v1339_v54 }
  0x7e   : > { %2316 = vmatprep.mubr.msk.f32.mxu1 %vm248_vm0, %v2016_v4  ;;  %2368 = vmatprep.mubr.msk.f32.mxu0 %vm248_vm0, %v2081_v5 }
  0x81   : > { %2317 = vmatmul.mubr.msk.f32.gmra.mrb[36].mxu1 %vm248_vm0, %v2017_v6  ;;  %2369 = vmatmul.mubr.msk.f32.gmra.mrb[36].mxu0 %vm248_vm0, %v2082_v7 }
  0x82   : > { %2319 = vmatprep.mubr.msk.f32.mxu1 %vm248_vm0, %v2018_v8  ;;  %2371 = vmatprep.mubr.msk.f32.mxu0 %vm248_vm0, %v2083_v9 }
  0x85   : > { %2320 = vmatmul.mubr.msk.f32.gmra.mrb[38].mxu1 %vm248_vm0, %v2019_v10  ;;  %2372 = vmatmul.mubr.msk.f32.gmra.mrb[38].mxu0 %vm248_vm0, %v2084_v11 }
  0x86   : > { %2322 = vmatprep.mubr.msk.f32.mxu1 %vm248_vm0, %v2020_v12  ;;  %2374 = vmatprep.mubr.msk.f32.mxu0 %vm248_vm0, %v2085_v13 }
  0x89   : > { %2323 = vmatmul.mubr.msk.f32.gmra.mrb[40].mxu1 %vm248_vm0, %v2021_v14  ;;  %2375 = vmatmul.mubr.msk.f32.gmra.mrb[40].mxu0 %vm248_vm0, %v2086_v15  ;;  %v3014_v14 = vmax.f32 %v781_v60, 0.0  ;;  %v3016_v15 = vmax.f32 %v1342_v61, 0.0 }
  0x8a   : > { %2325 = vmatprep.mubr.msk.f32.mxu1 %vm248_vm0, %v2022_v16  ;;  %2377 = vmatprep.mubr.msk.f32.mxu0 %vm248_vm0, %v2087_v17 }
  0x8d   : > { %2326 = vmatmul.mubr.msk.f32.gmra.mrb[42].mxu1 %vm248_vm0, %v2023_v18  ;;  %2378 = vmatmul.mubr.msk.f32.gmra.mrb[42].mxu0 %vm248_vm0, %v2088_v21 }
  0x8e   : > { %2328 = vmatprep.mubr.msk.f32.mxu1 %vm248_vm0, %v2024_v22  ;;  %2380 = vmatprep.mubr.msk.f32.mxu0 %vm248_vm0, %v2089_v23 }
  0x91   : > { %2329 = vmatmul.mubr.msk.f32.gmra.mrb[44].mxu1 %vm248_vm0, %v2025_v24  ;;  %2381 = vmatmul.mubr.msk.f32.gmra.mrb[44].mxu0 %vm248_vm0, %v2090_v26  ;;  %v3020_v24 = vmax.f32 %v780_v2, 0.0  ;;  %v3022_v26 = vmax.f32 %v1341_v3, 0.0 }
  0x92   : > { %2331 = vmatprep.mubr.msk.f32.mxu1 %vm248_vm0, %v2026_v28  ;;  %2383 = vmatprep.mubr.msk.f32.mxu0 %vm248_vm0, %v2091_v30 }
  0x95   : > { %2332 = vmatmul.mubr.msk.f32.gmra.mrb[46].mxu1 %vm248_vm0, %v2027_v31  ;;  %2384 = vmatmul.mubr.msk.f32.gmra.mrb[46].mxu0 %vm248_vm0, %v2092_v32 }
 0x10c   : > { %v2236_v44 = vpop.f32.mrb[0].mxu0  ;;  %v2260_v45 = vpop.f32.mrb[0].mxu1 }
 0x10d   : > { %v571_v46 = vmul.f32 %v2236_v44, %v2992_v39  ;;  %v587_v47 = vmul.f32 %v2260_v45, %v2992_v39  ;;  %v411_v48 = vpop.f32.mrb[1].mxu0  ;;  %v491_v49 = vpop.f32.mrb[1].mxu1 }
 0x10e   : > { %v570_v20 = vmul.f32 %v411_v48, %v2998_v42  ;;  %v586_v52 = vmul.f32 %v491_v49, %v2998_v42 }
 0x110   : > { %v602_v27 = vadd.f32 %v571_v46, %v570_v20  ;;  %v658_v55 = vadd.f32 %v587_v47, %v586_v52  ;;  %v2239_v56 = vpop.f32.mrb[2].mxu0  ;;  %v2263_v19 = vpop.f32.mrb[2].mxu1 }
 0x111   : > { %v573_v29 = vmul.f32 %v2239_v56, %v2992_v39  ;;  %v589_v57 = vmul.f32 %v2263_v19, %v2992_v39  ;;  %v421_v58 = vpop.f32.mrb[3].mxu0  ;;  %v501_v59 = vpop.f32.mrb[3].mxu1 }
 0x112   : > { %v603_v62 = vrot.slane %v602_v27, 4  ;;  %v659_v63 = vrot.slane %v658_v55, 4  ;;  %v572_v0 = vmul.f32 %v421_v58, %v2998_v42  ;;  %v588_v1 = vmul.f32 %v501_v59, %v2998_v42 }
 0x114   : > { %v604_v4 = vadd.f32 %v603_v62, %v602_v27  ;;  %v660_v5 = vadd.f32 %v659_v63, %v658_v55  ;;  %v609_v6 = vadd.f32 %v573_v29, %v572_v0  ;;  %v665_v7 = vadd.f32 %v589_v57, %v588_v1  ;;  %v2242_v8 = vpop.f32.mrb[4].mxu0  ;;  %v2266_v9 = vpop.f32.mrb[4].mxu1 }
 0x115   : > { %v575_v10 = vmul.f32 %v2242_v8, %v2992_v39  ;;  %v591_v11 = vmul.f32 %v2266_v9, %v2992_v39  ;;  %v431_v12 = vpop.f32.mrb[5].mxu0  ;;  %v511_v13 = vpop.f32.mrb[5].mxu1 }
 0x116   : > { %v605_v16 = vrot.slane %v604_v4, 2  ;;  %v661_v17 = vrot.slane %v660_v5, 2  ;;  %v610_v18 = vrot.slane %v609_v6, 4  ;;  %v666_v21 = vrot.slane %v665_v7, 4 }
 0x117   : > { %v574_v22 = vmul.f32 %v431_v12, %v2998_v42  ;;  %v590_v23 = vmul.f32 %v511_v13, %v2998_v42 }
 0x118   : > { %v606_v28 = vadd.f32 %v605_v16, %v604_v4  ;;  %v662_v30 = vadd.f32 %v661_v17, %v660_v5  ;;  %v611_v31 = vadd.f32 %v610_v18, %v609_v6  ;;  %v667_v32 = vadd.f32 %v666_v21, %v665_v7  ;;  %v2245_v33 = vpop.f32.mrb[6].mxu0  ;;  %v2269_v34 = vpop.f32.mrb[6].mxu1 }
 0x119   : > { %v616_v35 = vadd.f32 %v575_v10, %v574_v22  ;;  %v672_v36 = vadd.f32 %v591_v11, %v590_v23  ;;  %v577_v37 = vmul.f32 %v2245_v33, %v2992_v39  ;;  %v593_v38 = vmul.f32 %v2269_v34, %v2992_v39  ;;  %v441_v40 = vpop.f32.mrb[7].mxu0  ;;  %v521_v41 = vpop.f32.mrb[7].mxu1 }
 0x11a   : > { %v607_v43 = vrot.slane %v606_v28, 1  ;;  %v663_v25 = vrot.slane %v662_v30, 1  ;;  %v612_v44 = vrot.slane %v611_v31, 2  ;;  %v668_v45 = vrot.slane %v667_v32, 2 }
 0x11b   : > { %v617_v46 = vrot.slane %v616_v35, 4  ;;  %v673_v47 = vrot.slane %v672_v36, 4  ;;  %v576_v48 = vmul.f32 %v441_v40, %v2998_v42  ;;  %v592_v49 = vmul.f32 %v521_v41, %v2998_v42 }
 0x11c   : > { %v608_v50 = vadd.f32 %v607_v43, %v606_v28  ;;  %v664_v51 = vadd.f32 %v663_v25, %v662_v30  ;;  %v613_v20 = vadd.f32 %v612_v44, %v611_v31  ;;  %v669_v52 = vadd.f32 %v668_v45, %v667_v32  ;;  %v2248_v53 = vpop.f32.mrb[8].mxu0  ;;  %v2272_v54 = vpop.f32.mrb[8].mxu1 }
 0x11d   : > { %v618_v27 = vadd.f32 %v617_v46, %v616_v35  ;;  %v674_v55 = vadd.f32 %v673_v47, %v672_v36  ;;  %v623_v56 = vadd.f32 %v577_v37, %v576_v48  ;;  %v679_v19 = vadd.f32 %v593_v38, %v592_v49  ;;  %v451_v29 = vpop.f32.mrb[9].mxu0  ;;  %v531_v57 = vpop.f32.mrb[9].mxu1 }
 0x11e   : > { %v614_v58 = vrot.slane %v613_v20, 1  ;;  %v670_v59 = vrot.slane %v669_v52, 1  ;;  %v579_v60 = vmul.f32 %v2248_v53, %v2992_v39  ;;  %v595_v61 = vmul.f32 %v2272_v54, %v2992_v39 }
 0x11f   : > { %v619_v62 = vrot.slane %v618_v27, 2  ;;  %v675_v63 = vrot.slane %v674_v55, 2  ;;  %v624_v0 = vrot.slane %v623_v56, 4  ;;  %v680_v1 = vrot.slane %v679_v19, 4 }
 0x120   : > { %v615_v2 = vadd.f32 %v614_v58, %v613_v20  ;;  %v671_v3 = vadd.f32 %v670_v59, %v669_v52  ;;  %v578_v4 = vmul.f32 %v451_v29, %v2998_v42  ;;  %v594_v5 = vmul.f32 %v531_v57, %v2998_v42  ;;  %v2251_v6 = vpop.f32.mrb[10].mxu0  ;;  %v2275_v7 = vpop.f32.mrb[10].mxu1 }
 0x121   : > { %v620_v8 = vadd.f32 %v619_v62, %v618_v27  ;;  %v676_v9 = vadd.f32 %v675_v63, %v674_v55  ;;  %v625_v10 = vadd.f32 %v624_v0, %v623_v56  ;;  %v681_v11 = vadd.f32 %v680_v1, %v679_v19  ;;  %v461_v12 = vpop.f32.mrb[11].mxu0  ;;  %v541_v13 = vpop.f32.mrb[11].mxu1 }
 0x122   : > { %v731_v16 = vsel %vm730_vm1, %v615_v2, %v608_v50  ;;  %v744_v17 = vsel %vm730_vm1, %v671_v3, %v664_v51  ;;  %v630_v18 = vadd.f32 %v579_v60, %v578_v4  ;;  %v686_v21 = vadd.f32 %v595_v61, %v594_v5 }
 0x123   : > { %v621_v22 = vrot.slane %v620_v8, 1  ;;  %v677_v23 = vrot.slane %v676_v9, 1  ;;  %v626_v28 = vrot.slane %v625_v10, 2  ;;  %v682_v30 = vrot.slane %v681_v11, 2 }
 0x124   : > { %v631_v31 = vrot.slane %v630_v18, 4  ;;  %v687_v32 = vrot.slane %v686_v21, 4  ;;  %v581_v33 = vmul.f32 %v2251_v6, %v2992_v39  ;;  %v597_v34 = vmul.f32 %v2275_v7, %v2992_v39  ;;  %v2254_v35 = vpop.f32.mrb[12].mxu0  ;;  %v2278_v36 = vpop.f32.mrb[12].mxu1 }
 0x125   : > { %v622_v37 = vadd.f32 %v621_v22, %v620_v8  ;;  %v678_v38 = vadd.f32 %v677_v23, %v676_v9  ;;  %v627_v40 = vadd.f32 %v626_v28, %v625_v10  ;;  %v683_v41 = vadd.f32 %v682_v30, %v681_v11  ;;  %v471_v43 = vpop.f32.mrb[13].mxu0  ;;  %v551_v25 = vpop.f32.mrb[13].mxu1 }
 0x126   : > { %v632_v44 = vadd.f32 %v631_v31, %v630_v18  ;;  %v688_v45 = vadd.f32 %v687_v32, %v686_v21  ;;  %v580_v46 = vmul.f32 %v461_v12, %v2998_v42  ;;  %v596_v47 = vmul.f32 %v541_v13, %v2998_v42 }
 0x127   : > { %v733_v48 = vsel %vm732_vm2, %v622_v37, %v731_v16  ;;  %v745_v49 = vsel %vm732_vm2, %v678_v38, %v744_v17  ;;  %v628_v50 = vrot.slane %v627_v40, 1  ;;  %v684_v51 = vrot.slane %v683_v41, 1 }
 0x128   : > { %v633_v20 = vrot.slane %v632_v44, 2  ;;  %v689_v52 = vrot.slane %v688_v45, 2  ;;  %v637_v53 = vadd.f32 %v581_v33, %v580_v46  ;;  %v693_v54 = vadd.f32 %v597_v34, %v596_v47  ;;  %v2257_v27 = vpop.f32.mrb[14].mxu0  ;;  %v2281_v55 = vpop.f32.mrb[14].mxu1 }
 0x129   : > { %v629_v56 = vadd.f32 %v628_v50, %v627_v40  ;;  %v685_v19 = vadd.f32 %v684_v51, %v683_v41  ;;  %v583_v29 = vmul.f32 %v2254_v35, %v2992_v39  ;;  %v599_v57 = vmul.f32 %v2278_v36, %v2992_v39  ;;  %v481_v58 = vpop.f32.mrb[15].mxu0  ;;  %v561_v59 = vpop.f32.mrb[15].mxu1 }
 0x12a   : > { %v634_v60 = vadd.f32 %v633_v20, %v632_v44  ;;  %v690_v61 = vadd.f32 %v689_v52, %v688_v45  ;;  %v638_v62 = vrot.slane %v637_v53, 4  ;;  %v694_v63 = vrot.slane %v693_v54, 4 }
 0x12b   : > { %v735_v0 = vsel %vm734_vm3, %v629_v56, %v733_v48  ;;  %v746_v1 = vsel %vm734_vm3, %v685_v19, %v745_v49  ;;  %v582_v2 = vmul.f32 %v471_v43, %v2998_v42  ;;  %v598_v3 = vmul.f32 %v551_v25, %v2998_v42 }
 0x12c   : > { %v635_v4 = vrot.slane %v634_v60, 1  ;;  %v691_v5 = vrot.slane %v690_v61, 1  ;;  %v639_v6 = vadd.f32 %v638_v62, %v637_v53  ;;  %v695_v7 = vadd.f32 %v694_v63, %v693_v54  ;;  %v2288_v8 = vpop.f32.mrb[16].mxu1  ;;  %v2340_v9 = vpop.f32.mrb[16].mxu0 }
 0x12d   : > { %v644_v10 = vadd.f32 %v583_v29, %v582_v2  ;;  %v700_v11 = vadd.f32 %v599_v57, %v598_v3  ;;  %v585_v12 = vmul.f32 %v2257_v27, %v2992_v39  ;;  %v601_v13 = vmul.f32 %v2281_v55, %v2992_v39  ;;  %v979_v16 = vpop.f32.mrb[17].mxu1  ;;  %v1540_v17 = vpop.f32.mrb[17].mxu0 }
 0x12e   : > { %v636_v18 = vadd.f32 %v635_v4, %v634_v60  ;;  %v692_v21 = vadd.f32 %v691_v5, %v690_v61  ;;  %v640_v22 = vrot.slane %v639_v6, 2  ;;  %v696_v23 = vrot.slane %v695_v7, 2 }
 0x12f   : > { %v645_v28 = vrot.slane %v644_v10, 4  ;;  %v701_v30 = vrot.slane %v700_v11, 4  ;;  %v584_v31 = vmul.f32 %v481_v58, %v2998_v42  ;;  %v600_v32 = vmul.f32 %v561_v59, %v2998_v42 }
 0x130   : > { %v737_v33 = vsel %vm736_vm4, %v636_v18, %v735_v0  ;;  %v747_v34 = vsel %vm736_vm4, %v692_v21, %v746_v1  ;;  %v641_v35 = vadd.f32 %v640_v22, %v639_v6  ;;  %v697_v36 = vadd.f32 %v696_v23, %v695_v7  ;;  %v2291_v39 = vpop.f32.mrb[18].mxu1  ;;  %v2343_v37 = vpop.f32.mrb[18].mxu0 }
 0x131   : > { %v646_v38 = vadd.f32 %v645_v28, %v644_v10  ;;  %v702_v40 = vadd.f32 %v701_v30, %v700_v11  ;;  %v651_v41 = vadd.f32 %v585_v12, %v584_v31  ;;  %v707_v43 = vadd.f32 %v601_v13, %v600_v32  ;;  %v989_v25 = vpop.f32.mrb[19].mxu1  ;;  %v1550_v44 = vpop.f32.mrb[19].mxu0 }
 0x132   : > { %v642_v45 = vrot.slane %v641_v35, 1  ;;  %v698_v46 = vrot.slane %v697_v36, 1  ;;  %v1139_v47 = vmul.f32 %v2288_v8, %v3014_v14  ;;  %v1700_v42 = vmul.f32 %v2340_v9, %v3016_v15 }
 0x133   : > { %v647_v48 = vrot.slane %v646_v38, 2  ;;  %v703_v49 = vrot.slane %v702_v40, 2  ;;  %v652_v50 = vrot.slane %v651_v41, 4  ;;  %v708_v51 = vrot.slane %v707_v43, 4 }
 0x134   : > { %v643_v20 = vadd.f32 %v642_v45, %v641_v35  ;;  %v699_v52 = vadd.f32 %v698_v46, %v697_v36  ;;  %v1138_v53 = vmul.f32 %v979_v16, %v3020_v24  ;;  %v1699_v54 = vmul.f32 %v1540_v17, %v3022_v26  ;;  %v2294_v27 = vpop.f32.mrb[20].mxu1  ;;  %v2346_v55 = vpop.f32.mrb[20].mxu0 }
 0x135   : > { %v648_v56 = vadd.f32 %v647_v48, %v646_v38  ;;  %v704_v19 = vadd.f32 %v703_v49, %v702_v40  ;;  %v653_v29 = vadd.f32 %v652_v50, %v651_v41  ;;  %v709_v57 = vadd.f32 %v708_v51, %v707_v43  ;;  %v999_v58 = vpop.f32.mrb[21].mxu1  ;;  %v1560_v59 = vpop.f32.mrb[21].mxu0 }
 0x136   : > { %v739_v60 = vsel %vm738_vm5, %v643_v20, %v737_v33  ;;  %v748_v61 = vsel %vm738_vm5, %v699_v52, %v747_v34  ;;  %v1170_v62 = vadd.f32 %v1139_v47, %v1138_v53  ;;  %v1731_v63 = vadd.f32 %v1700_v42, %v1699_v54 }
 0x137   : > { %v649_v0 = vrot.slane %v648_v56, 1  ;;  %v705_v1 = vrot.slane %v704_v19, 1  ;;  %v654_v2 = vrot.slane %v653_v29, 2  ;;  %v710_v3 = vrot.slane %v709_v57, 2 }
 0x138   : > { %v1171_v4 = vrot.slane %v1170_v62, 4  ;;  %v1732_v5 = vrot.slane %v1731_v63, 4  ;;  %v1141_v6 = vmul.f32 %v2291_v39, %v3014_v14  ;;  %v1702_v7 = vmul.f32 %v2343_v37, %v3016_v15  ;;  %v2297_v8 = vpop.f32.mrb[22].mxu1  ;;  %v2349_v9 = vpop.f32.mrb[22].mxu0 }
 0x139   : > { %v650_v10 = vadd.f32 %v649_v0, %v648_v56  ;;  %v706_v11 = vadd.f32 %v705_v1, %v704_v19  ;;  %v655_v12 = vadd.f32 %v654_v2, %v653_v29  ;;  %v711_v13 = vadd.f32 %v710_v3, %v709_v57  ;;  %v1009_v16 = vpop.f32.mrb[23].mxu1  ;;  %v1570_v17 = vpop.f32.mrb[23].mxu0 }
 0x13a   : > { %v1172_v18 = vadd.f32 %v1171_v4, %v1170_v62  ;;  %v1733_v21 = vadd.f32 %v1732_v5, %v1731_v63  ;;  %v1140_v22 = vmul.f32 %v989_v25, %v3020_v24  ;;  %v1701_v23 = vmul.f32 %v1550_v44, %v3022_v26 }
 0x13b   : > { %v741_v28 = vsel %vm740_vm6, %v650_v10, %v739_v60  ;;  %v749_v30 = vsel %vm740_vm6, %v706_v11, %v748_v61  ;;  %v656_v31 = vrot.slane %v655_v12, 1  ;;  %v712_v32 = vrot.slane %v711_v13, 1 }
 0x13c   : > { %v1173_v33 = vrot.slane %v1172_v18, 2  ;;  %v1734_v34 = vrot.slane %v1733_v21, 2  ;;  %v1177_v35 = vadd.f32 %v1141_v6, %v1140_v22  ;;  %v1738_v36 = vadd.f32 %v1702_v7, %v1701_v23  ;;  %v2300_v39 = vpop.f32.mrb[24].mxu1  ;;  %v2352_v37 = vpop.f32.mrb[24].mxu0 }
 0x13d   : > { %v657_v38 = vadd.f32 %v656_v31, %v655_v12  ;;  %v713_v40 = vadd.f32 %v712_v32, %v711_v13  ;;  %v1143_v41 = vmul.f32 %v2294_v27, %v3014_v14  ;;  %v1704_v43 = vmul.f32 %v2346_v55, %v3016_v15  ;;  %v1019_v25 = vpop.f32.mrb[25].mxu1  ;;  %v1580_v44 = vpop.f32.mrb[25].mxu0 }
 0x13e   : > { %v1174_v45 = vadd.f32 %v1173_v33, %v1172_v18  ;;  %v1735_v46 = vadd.f32 %v1734_v34, %v1733_v21  ;;  %v1178_v47 = vrot.slane %v1177_v35, 4  ;;  %v1739_v42 = vrot.slane %v1738_v36, 4 }
 0x13f   : > { %v743_v48 = vsel %vm742_vm7, %v657_v38, %v741_v28  ;;  %v750_v49 = vsel %vm742_vm7, %v713_v40, %v749_v30  ;;  %v1142_v50 = vmul.f32 %v999_v58, %v3020_v24  ;;  %v1703_v51 = vmul.f32 %v1560_v59, %v3022_v26 }
 0x140   : > { %753 = vst [vmem:[%s3073_s25] sm:$0xff] %v743_v48  ;;  %754 = vst [vmem:[%s3073_s25 + $0x8] sm:$0xff] %v750_v49  ;;  %v1175_v20 = vrot.slane %v1174_v45, 1  ;;  %v1736_v52 = vrot.slane %v1735_v46, 1  ;;  %v1179_v53 = vadd.f32 %v1178_v47, %v1177_v35  ;;  %v1740_v54 = vadd.f32 %v1739_v42, %v1738_v36  ;;  %v2303_v27 = vpop.f32.mrb[26].mxu1  ;;  %v2355_v55 = vpop.f32.mrb[26].mxu0 }
 0x141   : > { %v1184_v56 = vadd.f32 %v1143_v41, %v1142_v50  ;;  %v1745_v19 = vadd.f32 %v1704_v43, %v1703_v51  ;;  %v1145_v29 = vmul.f32 %v2297_v8, %v3014_v14  ;;  %v1706_v57 = vmul.f32 %v2349_v9, %v3016_v15  ;;  %v3079_v58 = vpop.f32.mrb[27].mxu1  ;;  %v3081_v59 = vpop.f32.mrb[27].mxu0 }
 0x142   : > { %v1176_v60 = vadd.f32 %v1175_v20, %v1174_v45  ;;  %v1737_v61 = vadd.f32 %v1736_v52, %v1735_v46  ;;  %v1180_v62 = vrot.slane %v1179_v53, 2  ;;  %v1741_v63 = vrot.slane %v1740_v54, 2 }
 0x143   : > { %v1185_v0 = vrot.slane %v1184_v56, 4  ;;  %v1746_v1 = vrot.slane %v1745_v19, 4  ;;  %v1144_v2 = vmul.f32 %v1009_v16, %v3020_v24  ;;  %v1705_v3 = vmul.f32 %v1570_v17, %v3022_v26 }
 0x144   : > { %v1181_v4 = vadd.f32 %v1180_v62, %v1179_v53  ;;  %v1742_v5 = vadd.f32 %v1741_v63, %v1740_v54  ;;  %v1147_v6 = vmul.f32 %v2300_v39, %v3014_v14  ;;  %v1708_v7 = vmul.f32 %v2352_v37, %v3016_v15  ;;  %v3087_v8 = vpop.f32.mrb[28].mxu1  ;;  %v3089_v9 = vpop.f32.mrb[28].mxu0 }
 0x145   : > { %v1186_v10 = vadd.f32 %v1185_v0, %v1184_v56  ;;  %v1747_v11 = vadd.f32 %v1746_v1, %v1745_v19  ;;  %v1191_v12 = vadd.f32 %v1145_v29, %v1144_v2  ;;  %v1752_v13 = vadd.f32 %v1706_v57, %v1705_v3  ;;  %v3091_v18 = vpop.f32.mrb[29].mxu1  ;;  %v3093_v21 = vpop.f32.mrb[29].mxu0 }
 0x146   : > { %v1182_v16 = vrot.slane %v1181_v4, 1  ;;  %v1743_v17 = vrot.slane %v1742_v5, 1  ;;  %v1146_v22 = vmul.f32 %v1019_v25, %v3020_v24  ;;  %v1707_v23 = vmul.f32 %v1580_v44, %v3022_v26 }
 0x147   : > { %v1187_v28 = vrot.slane %v1186_v10, 2  ;;  %v1748_v30 = vrot.slane %v1747_v11, 2  ;;  %v1192_v31 = vrot.slane %v1191_v12, 4  ;;  %v1753_v32 = vrot.slane %v1752_v13, 4 }
 0x148   : > { %v1183_v33 = vadd.f32 %v1182_v16, %v1181_v4  ;;  %v1744_v34 = vadd.f32 %v1743_v17, %v1742_v5  ;;  %v1198_v35 = vadd.f32 %v1147_v6, %v1146_v22  ;;  %v1759_v36 = vadd.f32 %v1708_v7, %v1707_v23  ;;  %v3097_v39 = vpop.f32.mrb[30].mxu1  ;;  %v3099_v37 = vpop.f32.mrb[30].mxu0 }
 0x149   : > { %v1188_v38 = vadd.f32 %v1187_v28, %v1186_v10  ;;  %v1749_v40 = vadd.f32 %v1748_v30, %v1747_v11  ;;  %v1193_v41 = vadd.f32 %v1192_v31, %v1191_v12  ;;  %v1754_v43 = vadd.f32 %v1753_v32, %v1752_v13  ;;  %v3101_v45 = vpop.f32.mrb[31].mxu1  ;;  %v3103_v25 = vpop.f32.mrb[31].mxu0 }
 0x14a   : > { %v1298_v44 = vsel %vm730_vm1, %v1183_v33, %v1176_v60  ;;  %v1859_v46 = vsel %vm730_vm1, %v1744_v34, %v1737_v61  ;;  %v1199_v47 = vrot.slane %v1198_v35, 4  ;;  %v1760_v42 = vrot.slane %v1759_v36, 4 }
 0x14b   : > { %v1189_v48 = vrot.slane %v1188_v38, 1  ;;  %v1750_v49 = vrot.slane %v1749_v40, 1  ;;  %v1194_v50 = vrot.slane %v1193_v41, 2  ;;  %v1755_v51 = vrot.slane %v1754_v43, 2 }
 0x14c   : > { %v1200_v20 = vadd.f32 %v1199_v47, %v1198_v35  ;;  %v1761_v52 = vadd.f32 %v1760_v42, %v1759_v36  ;;  %v1149_v53 = vmul.f32 %v2303_v27, %v3014_v14  ;;  %v1710_v54 = vmul.f32 %v2355_v55, %v3016_v15  ;;  %v2312_v56 = vpop.f32.mrb[32].mxu1  ;;  %v2364_v19 = vpop.f32.mrb[32].mxu0 }
 0x14d   : > { %v1190_v29 = vadd.f32 %v1189_v48, %v1188_v38  ;;  %v1751_v57 = vadd.f32 %v1750_v49, %v1749_v40  ;;  %v1195_v62 = vadd.f32 %v1194_v50, %v1193_v41  ;;  %v1756_v60 = vadd.f32 %v1755_v51, %v1754_v43  ;;  %v3109_v63 = vpop.f32.mrb[33].mxu1  ;;  %v3111_v61 = vpop.f32.mrb[33].mxu0 }
 0x14e   : > { %v1201_v0 = vrot.slane %v1200_v20, 2  ;;  %v1762_v1 = vrot.slane %v1761_v52, 2  ;;  %v1148_v2 = vmul.f32 %v3079_v58, %v3020_v24  ;;  %v1709_v27 = vmul.f32 %v3081_v59, %v3022_v26 }
 0x14f   : > { %v1299_v55 = vsel %vm732_vm2, %v1190_v29, %v1298_v44  ;;  %v1860_v3 = vsel %vm732_vm2, %v1751_v57, %v1859_v46  ;;  %v1196_v4 = vrot.slane %v1195_v62, 1  ;;  %v1757_v5 = vrot.slane %v1756_v60, 1 }
 0x150   : > { %v1202_v6 = vadd.f32 %v1201_v0, %v1200_v20  ;;  %v1763_v7 = vadd.f32 %v1762_v1, %v1761_v52  ;;  %v1205_v10 = vadd.f32 %v1149_v53, %v1148_v2  ;;  %v1766_v11 = vadd.f32 %v1710_v54, %v1709_v27  ;;  %v3119_v12 = vpop.f32.mrb[34].mxu1  ;;  %v3121_v13 = vpop.f32.mrb[34].mxu0 }
 0x151   : > { %v1197_v16 = vadd.f32 %v1196_v4, %v1195_v62  ;;  %v1758_v17 = vadd.f32 %v1757_v5, %v1756_v60  ;;  %v1151_v58 = vmul.f32 %v3087_v8, %v3014_v14  ;;  %v1712_v59 = vmul.f32 %v3089_v9, %v3016_v15  ;;  %v3127_v22 = vpop.f32.mrb[35].mxu1  ;;  %v3129_v23 = vpop.f32.mrb[35].mxu0 }
 0x152   : > { %v1203_v28 = vrot.slane %v1202_v6, 1  ;;  %v1764_v30 = vrot.slane %v1763_v7, 1  ;;  %v1206_v31 = vrot.slane %v1205_v10, 4  ;;  %v1767_v32 = vrot.slane %v1766_v11, 4 }
 0x153   : > { %v1300_v33 = vsel %vm734_vm3, %v1197_v16, %v1299_v55  ;;  %v1861_v34 = vsel %vm734_vm3, %v1758_v17, %v1860_v3  ;;  %v1150_v35 = vmul.f32 %v3091_v18, %v3020_v24  ;;  %v1711_v8 = vmul.f32 %v3093_v21, %v3022_v26 }
 0x154   : > { %v1204_v36 = vadd.f32 %v1203_v28, %v1202_v6  ;;  %v1765_v9 = vadd.f32 %v1764_v30, %v1763_v7  ;;  %v1207_v38 = vadd.f32 %v1206_v31, %v1205_v10  ;;  %v1768_v40 = vadd.f32 %v1767_v32, %v1766_v11  ;;  %v3137_v41 = vpop.f32.mrb[36].mxu1  ;;  %v3139_v43 = vpop.f32.mrb[36].mxu0 }
 0x155   : > { %v1212_v44 = vadd.f32 %v1151_v58, %v1150_v35  ;;  %v1773_v46 = vadd.f32 %v1712_v59, %v1711_v8  ;;  %v1153_v47 = vmul.f32 %v3097_v39, %v3014_v14  ;;  %v1714_v42 = vmul.f32 %v3099_v37, %v3016_v15  ;;  %v3145_v18 = vpop.f32.mrb[37].mxu1  ;;  %v3147_v48 = vpop.f32.mrb[37].mxu0 }
 0x156   : > { %v1301_v21 = vsel %vm736_vm4, %v1204_v36, %v1300_v33  ;;  %v1862_v49 = vsel %vm736_vm4, %v1765_v9, %v1861_v34  ;;  %v1208_v50 = vrot.slane %v1207_v38, 2  ;;  %v1769_v51 = vrot.slane %v1768_v40, 2 }
 0x157   : > { %v1213_v20 = vrot.slane %v1212_v44, 4  ;;  %v1774_v52 = vrot.slane %v1773_v46, 4  ;;  %v1152_v53 = vmul.f32 %v3101_v45, %v3020_v24  ;;  %v1713_v39 = vmul.f32 %v3103_v25, %v3022_v26 }
 0x158   : > { %v1209_v54 = vadd.f32 %v1208_v50, %v1207_v38  ;;  %v1770_v37 = vadd.f32 %v1769_v51, %v1768_v40  ;;  %v1155_v29 = vmul.f32 %v2312_v56, %v3014_v14  ;;  %v1716_v57 = vmul.f32 %v2364_v19, %v3016_v15  ;;  %v3157_v62 = vpop.f32.mrb[38].mxu1  ;;  %v3159_v60 = vpop.f32.mrb[38].mxu0 }
 0x159   : > { %v1214_v0 = vadd.f32 %v1213_v20, %v1212_v44  ;;  %v1775_v1 = vadd.f32 %v1774_v52, %v1773_v46  ;;  %v1219_v2 = vadd.f32 %v1153_v47, %v1152_v53  ;;  %v1780_v27 = vadd.f32 %v1714_v42, %v1713_v39  ;;  %v3161_v55 = vpop.f32.mrb[39].mxu1  ;;  %v3163_v45 = vpop.f32.mrb[39].mxu0 }
 0x15a   : > { %v1210_v3 = vrot.slane %v1209_v54, 1  ;;  %v1771_v25 = vrot.slane %v1770_v37, 1  ;;  %v1154_v4 = vmul.f32 %v3109_v63, %v3020_v24  ;;  %v1715_v56 = vmul.f32 %v3111_v61, %v3022_v26 }
 0x15b   : > { %v1215_v19 = vrot.slane %v1214_v0, 2  ;;  %v1776_v5 = vrot.slane %v1775_v1, 2  ;;  %v1220_v6 = vrot.slane %v1219_v2, 4  ;;  %v1781_v7 = vrot.slane %v1780_v27, 4 }
 0x15c   : > { %v1211_v10 = vadd.f32 %v1210_v3, %v1209_v54  ;;  %v1772_v11 = vadd.f32 %v1771_v25, %v1770_v37  ;;  %v1226_v16 = vadd.f32 %v1155_v29, %v1154_v4  ;;  %v1787_v17 = vadd.f32 %v1716_v57, %v1715_v56  ;;  %v3169_v58 = vpop.f32.mrb[40].mxu1  ;;  %v3171_v59 = vpop.f32.mrb[40].mxu0 }
 0x15d   : > { %v1216_v28 = vadd.f32 %v1215_v19, %v1214_v0  ;;  %v1777_v30 = vadd.f32 %v1776_v5, %v1775_v1  ;;  %v1221_v31 = vadd.f32 %v1220_v6, %v1219_v2  ;;  %v1782_v32 = vadd.f32 %v1781_v7, %v1780_v27  ;;  %v3173_v63 = vpop.f32.mrb[41].mxu1  ;;  %v3175_v33 = vpop.f32.mrb[41].mxu0 }
 0x15e   : > { %v1302_v61 = vsel %vm738_vm5, %v1211_v10, %v1301_v21  ;;  %v1863_v34 = vsel %vm738_vm5, %v1772_v11, %v1862_v49  ;;  %v1227_v35 = vrot.slane %v1226_v16, 4  ;;  %v1788_v8 = vrot.slane %v1787_v17, 4 }
 0x15f   : > { %v1217_v36 = vrot.slane %v1216_v28, 1  ;;  %v1778_v9 = vrot.slane %v1777_v30, 1  ;;  %v1222_v38 = vrot.slane %v1221_v31, 2  ;;  %v1783_v40 = vrot.slane %v1782_v32, 2 }
 0x160   : > { %v1228_v44 = vadd.f32 %v1227_v35, %v1226_v16  ;;  %v1789_v46 = vadd.f32 %v1788_v8, %v1787_v17  ;;  %v1157_v47 = vmul.f32 %v3119_v12, %v3014_v14  ;;  %v1718_v42 = vmul.f32 %v3121_v13, %v3016_v15  ;;  %v3183_v50 = vpop.f32.mrb[42].mxu1  ;;  %v3185_v51 = vpop.f32.mrb[42].mxu0 }
 0x161   : > { %v1218_v21 = vadd.f32 %v1217_v36, %v1216_v28  ;;  %v1779_v49 = vadd.f32 %v1778_v9, %v1777_v30  ;;  %v1223_v20 = vadd.f32 %v1222_v38, %v1221_v31  ;;  %v1784_v52 = vadd.f32 %v1783_v40, %v1782_v32  ;;  %v3187_v53 = vpop.f32.mrb[43].mxu1  ;;  %v3189_v39 = vpop.f32.mrb[43].mxu0 }
 0x162   : > { %v1229_v54 = vrot.slane %v1228_v44, 2  ;;  %v1790_v37 = vrot.slane %v1789_v46, 2  ;;  %v1156_v12 = vmul.f32 %v3127_v22, %v3020_v24  ;;  %v1717_v13 = vmul.f32 %v3129_v23, %v3022_v26 }
 0x163   : > { %v1303_v29 = vsel %vm740_vm6, %v1218_v21, %v1302_v61  ;;  %v1864_v57 = vsel %vm740_vm6, %v1779_v49, %v1863_v34  ;;  %v1224_v0 = vrot.slane %v1223_v20, 1  ;;  %v1785_v1 = vrot.slane %v1784_v52, 1 }
 0x164   : > { %v1230_v2 = vadd.f32 %v1229_v54, %v1228_v44  ;;  %v1791_v27 = vadd.f32 %v1790_v37, %v1789_v46  ;;  %v1233_v3 = vadd.f32 %v1157_v47, %v1156_v12  ;;  %v1794_v25 = vadd.f32 %v1718_v42, %v1717_v13  ;;  %v3197_v4 = vpop.f32.mrb[44].mxu1  ;;  %v3199_v56 = vpop.f32.mrb[44].mxu0 }
 0x165   : > { %v1225_v22 = vadd.f32 %v1224_v0, %v1223_v20  ;;  %v1786_v19 = vadd.f32 %v1785_v1, %v1784_v52  ;;  %v1159_v23 = vmul.f32 %v3137_v41, %v3014_v14  ;;  %v1720_v5 = vmul.f32 %v3139_v43, %v3016_v15  ;;  %v3205_v6 = vpop.f32.mrb[45].mxu1  ;;  %v3207_v7 = vpop.f32.mrb[45].mxu0 }
 0x166   : > { %v1231_v10 = vrot.slane %v1230_v2, 1  ;;  %v1792_v11 = vrot.slane %v1791_v27, 1  ;;  %v1234_v16 = vrot.slane %v1233_v3, 4  ;;  %v1795_v17 = vrot.slane %v1794_v25, 4 }
 0x167   : > { %v1304_v28 = vsel %vm742_vm7, %v1225_v22, %v1303_v29  ;;  %v1865_v30 = vsel %vm742_vm7, %v1786_v19, %v1864_v57  ;;  %v1158_v31 = vmul.f32 %v3145_v18, %v3020_v24  ;;  %v1719_v41 = vmul.f32 %v3147_v48, %v3022_v26 }
 0x168   : > { %1314 = vst [vmem:[%s3073_s25 + $0x10] sm:$0xff] %v1304_v28  ;;  %1875 = vst [vmem:[%s3073_s25 + $0x20] sm:$0xff] %v1865_v30  ;;  %v1232_v43 = vadd.f32 %v1231_v10, %v1230_v2  ;;  %v1793_v32 = vadd.f32 %v1792_v11, %v1791_v27  ;;  %v1235_v61 = vadd.f32 %v1234_v16, %v1233_v3  ;;  %v3217_v35 = vpop.f32.mrb[46].mxu1  ;;  %v3219_v8 = vpop.f32.mrb[46].mxu0 }
 0x169   : > { %v1796_v34 = vadd.f32 %v1795_v17, %v1794_v25  ;;  %v1240_v36 = vadd.f32 %v1159_v23, %v1158_v31  ;;  %v1801_v9 = vadd.f32 %v1720_v5, %v1719_v41  ;;  %v1161_v38 = vmul.f32 %v3157_v62, %v3014_v14  ;;  %v3225_v40 = vpop.f32.mrb[47].mxu1  ;;  %v3227_v48 = vpop.f32.mrb[47].mxu0 }
 0x16a   : > { %v1722_v18 = vmul.f32 %v3159_v60, %v3016_v15  ;;  %v1236_v44 = vrot.slane %v1235_v61, 2  ;;  %v1160_v47 = vmul.f32 %v3161_v55, %v3020_v24  ;;  %v1721_v42 = vmul.f32 %v3163_v45, %v3022_v26 }
 0x16b   : > { %v1797_v46 = vrot.slane %v1796_v34, 2  ;;  %v1241_v21 = vrot.slane %v1240_v36, 4  ;;  %v1802_v49 = vrot.slane %v1801_v9, 4  ;;  %v1163_v62 = vmul.f32 %v3169_v58, %v3014_v14 }
 0x16c   : > { %v1724_v60 = vmul.f32 %v3171_v59, %v3016_v15  ;;  %v1237_v20 = vadd.f32 %v1236_v44, %v1235_v61  ;;  %v1247_v54 = vadd.f32 %v1161_v38, %v1160_v47  ;;  %v1808_v37 = vadd.f32 %v1722_v18, %v1721_v42 }
 0x16d   : > { %v1798_v52 = vadd.f32 %v1797_v46, %v1796_v34  ;;  %v1242_v12 = vadd.f32 %v1241_v21, %v1240_v36  ;;  %v1803_v13 = vadd.f32 %v1802_v49, %v1801_v9  ;;  %v1162_v55 = vmul.f32 %v3173_v63, %v3020_v24 }
 0x16e   : > { %v1723_v45 = vmul.f32 %v3175_v33, %v3022_v26  ;;  %v1238_v29 = vrot.slane %v1237_v20, 1  ;;  %v1248_v0 = vrot.slane %v1247_v54, 4  ;;  %v1809_v1 = vrot.slane %v1808_v37, 4 }
 0x16f   : > { %v1799_v57 = vrot.slane %v1798_v52, 1  ;;  %v1243_v58 = vrot.slane %v1242_v12, 2  ;;  %v1804_v2 = vrot.slane %v1803_v13, 2  ;;  %v1254_v27 = vadd.f32 %v1163_v62, %v1162_v55 }
 0x170   : > { %v1815_v59 = vadd.f32 %v1724_v60, %v1723_v45  ;;  %v1239_v3 = vadd.f32 %v1238_v29, %v1237_v20  ;;  %v1249_v22 = vadd.f32 %v1248_v0, %v1247_v54  ;;  %v1810_v19 = vadd.f32 %v1809_v1, %v1808_v37 }
 0x171   : > { %v1800_v25 = vadd.f32 %v1799_v57, %v1798_v52  ;;  %v1244_v23 = vadd.f32 %v1243_v58, %v1242_v12  ;;  %v1805_v5 = vadd.f32 %v1804_v2, %v1803_v13  ;;  %v1255_v10 = vrot.slane %v1254_v27, 4 }
 0x172   : > { %v1816_v11 = vrot.slane %v1815_v59, 4  ;;  %v1305_v63 = vsel %vm730_vm1, %v1239_v3, %v1232_v43  ;;  %v1250_v16 = vrot.slane %v1249_v22, 2  ;;  %v1811_v17 = vrot.slane %v1810_v19, 2 }
 0x173   : > { %v1866_v33 = vsel %vm730_vm1, %v1800_v25, %v1793_v32  ;;  %v1245_v28 = vrot.slane %v1244_v23, 1  ;;  %v1806_v30 = vrot.slane %v1805_v5, 1  ;;  %v1256_v31 = vadd.f32 %v1255_v10, %v1254_v27 }
 0x174   : > { %v1817_v41 = vadd.f32 %v1816_v11, %v1815_v59  ;;  %v1251_v61 = vadd.f32 %v1250_v16, %v1249_v22  ;;  %v1812_v34 = vadd.f32 %v1811_v17, %v1810_v19  ;;  %v1165_v36 = vmul.f32 %v3183_v50, %v3014_v14 }
 0x175   : > { %v1726_v9 = vmul.f32 %v3185_v51, %v3016_v15  ;;  %v1246_v38 = vadd.f32 %v1245_v28, %v1244_v23  ;;  %v1807_v18 = vadd.f32 %v1806_v30, %v1805_v5  ;;  %v1257_v44 = vrot.slane %v1256_v31, 2 }
 0x176   : > { %v1818_v43 = vrot.slane %v1817_v41, 2  ;;  %v1252_v46 = vrot.slane %v1251_v61, 1  ;;  %v1813_v32 = vrot.slane %v1812_v34, 1  ;;  %v1164_v47 = vmul.f32 %v3187_v53, %v3020_v24 }
 0x177   : > { %v1725_v42 = vmul.f32 %v3189_v39, %v3022_v26  ;;  %v1306_v21 = vsel %vm732_vm2, %v1246_v38, %v1305_v63  ;;  %v1867_v49 = vsel %vm732_vm2, %v1807_v18, %v1866_v33  ;;  %v1258_v50 = vadd.f32 %v1257_v44, %v1256_v31 }
 0x178   : > { %v1819_v62 = vadd.f32 %v1818_v43, %v1817_v41  ;;  %v1253_v60 = vadd.f32 %v1252_v46, %v1251_v61  ;;  %v1814_v51 = vadd.f32 %v1813_v32, %v1812_v34  ;;  %v1261_v20 = vadd.f32 %v1165_v36, %v1164_v47 }
 0x179   : > { %v1822_v52 = vadd.f32 %v1726_v9, %v1725_v42  ;;  %v1259_v54 = vrot.slane %v1258_v50, 1  ;;  %v1167_v12 = vmul.f32 %v3197_v4, %v3014_v14  ;;  %v1728_v53 = vmul.f32 %v3199_v56, %v3016_v15 }
 0x17a   : > { %v1820_v37 = vrot.slane %v1819_v62, 1  ;;  %v1307_v39 = vsel %vm734_vm3, %v1253_v60, %v1306_v21  ;;  %v1868_v13 = vsel %vm734_vm3, %v1814_v51, %v1867_v49  ;;  %v1262_v55 = vrot.slane %v1261_v20, 4 }
 0x17b   : > { %v1823_v45 = vrot.slane %v1822_v52, 4  ;;  %v1260_v29 = vadd.f32 %v1259_v54, %v1258_v50  ;;  %v1166_v0 = vmul.f32 %v3205_v6, %v3020_v24  ;;  %v1727_v1 = vmul.f32 %v3207_v7, %v3022_v26 }
 0x17c   : > { %v1821_v57 = vadd.f32 %v1820_v37, %v1819_v62  ;;  %v1263_v58 = vadd.f32 %v1262_v55, %v1261_v20  ;;  %v1169_v4 = vmul.f32 %v3217_v35, %v3014_v14  ;;  %v1730_v56 = vmul.f32 %v3219_v8, %v3016_v15 }
 0x17d   : > { %v1824_v2 = vadd.f32 %v1823_v45, %v1822_v52  ;;  %v1308_v27 = vsel %vm736_vm4, %v1260_v29, %v1307_v39  ;;  %v1268_v3 = vadd.f32 %v1167_v12, %v1166_v0  ;;  %v1829_v25 = vadd.f32 %v1728_v53, %v1727_v1 }
 0x17e   : > { %v1869_v59 = vsel %vm736_vm4, %v1821_v57, %v1868_v13  ;;  %v1264_v22 = vrot.slane %v1263_v58, 2  ;;  %v1168_v6 = vmul.f32 %v3225_v40, %v3020_v24  ;;  %v1729_v7 = vmul.f32 %v3227_v48, %v3022_v26 }
 0x17f   : > { %v1825_v19 = vrot.slane %v1824_v2, 2  ;;  %v1269_v23 = vrot.slane %v1268_v3, 4  ;;  %v1830_v5 = vrot.slane %v1829_v25, 4 }
 0x180   : > { %v1265_v14 = vadd.f32 %v1264_v22, %v1263_v58  ;;  %v1275_v10 = vadd.f32 %v1169_v4, %v1168_v6  ;;  %v1836_v15 = vadd.f32 %v1730_v56, %v1729_v7 }
 0x181   : > { %v1826_v35 = vadd.f32 %v1825_v19, %v1824_v2  ;;  %v1270_v8 = vadd.f32 %v1269_v23, %v1268_v3  ;;  %v1831_v11 = vadd.f32 %v1830_v5, %v1829_v25 }
 0x182   : > { %v1266_v63 = vrot.slane %v1265_v14, 1  ;;  %v1276_v16 = vrot.slane %v1275_v10, 4  ;;  %v1837_v17 = vrot.slane %v1836_v15, 4 }
 0x183   : > { %v1827_v33 = vrot.slane %v1826_v35, 1  ;;  %v1271_v28 = vrot.slane %v1270_v8, 2  ;;  %v1832_v30 = vrot.slane %v1831_v11, 2 }
 0x184   : > { %v1267_v31 = vadd.f32 %v1266_v63, %v1265_v14  ;;  %v1277_v40 = vadd.f32 %v1276_v16, %v1275_v10  ;;  %v1838_v26 = vadd.f32 %v1837_v17, %v1836_v15 }
 0x185   : > { %v1828_v24 = vadd.f32 %v1827_v33, %v1826_v35  ;;  %v1272_v48 = vadd.f32 %v1271_v28, %v1270_v8  ;;  %v1833_v41 = vadd.f32 %v1832_v30, %v1831_v11 }
 0x186   : > { %v1309_v61 = vsel %vm738_vm5, %v1267_v31, %v1308_v27  ;;  %v1278_v36 = vrot.slane %v1277_v40, 2  ;;  %v1839_v9 = vrot.slane %v1838_v26, 2 }
 0x187   : > { %v1870_v34 = vsel %vm738_vm5, %v1828_v24, %v1869_v59  ;;  %v1273_v38 = vrot.slane %v1272_v48, 1  ;;  %v1834_v18 = vrot.slane %v1833_v41, 1 }
 0x188   : > { %v1279_v44 = vadd.f32 %v1278_v36, %v1277_v40  ;;  %v1840_v43 = vadd.f32 %v1839_v9, %v1838_v26 }
 0x189   : > { %v1274_v46 = vadd.f32 %v1273_v38, %v1272_v48  ;;  %v1835_v32 = vadd.f32 %v1834_v18, %v1833_v41 }
 0x18a   : > { %v1280_v47 = vrot.slane %v1279_v44, 1  ;;  %v1841_v42 = vrot.slane %v1840_v43, 1 }
 0x18b   : > { %v1310_v21 = vsel %vm740_vm6, %v1274_v46, %v1309_v61  ;;  %v1871_v49 = vsel %vm740_vm6, %v1835_v32, %v1870_v34 }
 0x18c   : > { %v1281_v50 = vadd.f32 %v1280_v47, %v1279_v44  ;;  %v1842_v62 = vadd.f32 %v1841_v42, %v1840_v43 }
 0x18e   : > { %v1311_v60 = vsel %vm742_vm7, %v1281_v50, %v1310_v21  ;;  %v1872_v51 = vsel %vm742_vm7, %v1842_v62, %v1871_v49 }
 0x18f   : > { %1315 = vst [vmem:[%s3073_s25 + $0x18] sm:$0xff] %v1311_v60  ;;  %1876 = vst [vmem:[%s3073_s25 + $0x28] sm:$0xff] %v1872_v51 }
 0x190   : > { %2458 = shalt.err (!%p2455_p5)
}
 0x191   : > { %s2459_s8 = scalar_lea.hbm %s3283_s3, 768  ;;  %s2463_s17 = scalar_lea.hbm %s3335_s2, 1536 }
 0x192   : > { %p2460_p7 = scmp.ne.s32.totalorder %s3283_s3, %s2459_s8  ;;  %p2464_p12 = scmp.lt.u32.totalorder %s3283_s3, %s3335_s2 }
 0x193   : > { %p2465_p13 = scmp.lt.u32.totalorder %s2463_s17, %s2459_s8  ;;  %p2467_p1 = scmp.lt.u32.totalorder %s2459_s8, %s3283_s3 }
 0x194   : > { %p2461_p10 = pnand %p2460_p7, %p2566_p6 }
 0x195   : > { %p2466_p0 = por %p2465_p13, %p2464_p12 }
 0x196   : > { %p2462_p11 = pneg %p2461_p10 }
 0x197   : > { %p2468_p2 = por %p2467_p1, %p2466_p0 }
 0x199   : > { %p2469_p3 = pnand %p2468_p2, %p2462_p11 }
 0x19b   : > { %2472 = shalt.err (!%p2469_p3)
}
 0x19c   : > { %s2510_s23 = smov 128   ;;  %s2511_s24 = smov 256  }
 0x19d   : > { %s2512_s25 = smov 8  }
 0x19e   : > { %2403 = dma.vmem_to_hbm [thread:$0]  (%p2566_p6), %s3285_s27, 768, %s3283_s3, %s1878_s13, %s2510_s23, %s2511_s24, %s2512_s25  }
 0x19f PF: > { %s1905_s26 = sand.u32 1, %s2495_s9   ;;  %p2406_p4 = pnand %p1960_p9, %p2570_p8 }
 0x1a0   : > { %s1906_s29 = scalar_lea.sflag [#allocation4], %s1905_s26 }
 0x1a1   : > { %2490 = dma.done.wait (!%p2406_p4), %s1906_s29, 768  }
 0x1a2   : > { %2492 = vsyncadd (!%p2406_p4), %s1906_s29, 4294966528  ;;  %p12_p5 = scmp.ge.s32.totalorder %s2551_s15, 4   ;;  %s3338_s9 = smov %s2499_s10 }
 0x1a3   : > { %s3339_s10 = smov %s2503_s11  ;;  %s3340_s11 = smov %s2564_s18 }
 0x1a4   : > { %s3341_s12 = smov %s2551_s15  ;;  %14 = sbr.rel (!%p12_p5) target bundleno = 3 (0x3), region = 106 }
 0x1ab   :  { %1911 = vsyncpa [#allocation4], 1 }
 0x1ac   :  { %1913 = vsyncpa [#allocation4 + $0x1], 1 }

</bundles_post_ra>
